<compile_context>
chip_gen: v7x
topology: tpu7x:2x2x1
jax: 0.10.0
libtpu: 0.0.40
codegen_flags: <defaults>
</compile_context>

<pallas_src>
import functools
import math

import jax
import jax.numpy as jnp
from jax.experimental import pallas as pl
from jax.experimental.pallas import tpu as pltpu

# ----------------------------- config ---------------------------------------
EMBED_DIM = 32
N_HEADS = 4
HEAD_DIM = EMBED_DIM // N_HEADS
KSIZE = 4                      # canon_kernel_size
CTRL_INIT_SCALE = 0.01
GATE_BIAS_INIT = 0.5
GATE_REG_STRENGTH = 0.01       # gate_regularization_type = 'l1'
NEG_BIG = -1e30                # finite mask value (NaN-safe)

CTRL_KEYS = ("generation_flag", "memory_mode_flag", "memory_usage_ratio",
             "memory_density_ratio", "chunk_position_ratio")


# --------------------------- fused pallas kernel -----------------------------
def _cma_fused_kernel(xm_ref, wqkvg_ref, aux_ref, wo_ref, o_ref, reg_ref,
                      *, B, T, M, Sp, H, D, K, scale):
    """Single grid step: both batch elements, all stages, everything in VMEM/vregs."""
    C = H * D
    BT = B * T

    aux = aux_ref[...]                                   # (8, 3C+H) packed constants
    bias = aux[K + 1:K + 2, :]                           # [ctrl_q | 0 | 0 | bg_eff]

    # One MXU dispatch for q|k|v|gate-logits of every (chunk + padded memory) row
    # of both batch elements.
    proj = jnp.dot(xm_ref[...], wqkvg_ref[...],
                   preferred_element_type=jnp.float32) + bias        # (B*Sp, 3C+H)

    # Shared masks (hoisted out of all loops).
    col = jax.lax.broadcasted_iota(jnp.int32, (T, Sp), 1)
    row = jax.lax.broadcasted_iota(jnp.int32, (T, Sp), 0)
    score_mask = ((col < T) & (col > row)) | (col >= T + M)   # causal + pad columns
    mem_col = col >= T                                        # memory / pad columns

    batch_attn = []
    gate_sum = jnp.zeros((1, 1), jnp.float32)
    for b in range(B):                                    # static unroll, B = 2
        seg = proj[b * Sp:(b + 1) * Sp, :]                # (Sp, 3C+H), 8-aligned slice
        g = jax.nn.sigmoid(seg[:T, 3 * C:3 * C + H])      # (T, H) per-head memory gates

        head_outs = []
        for h in range(H):                                # static unroll, 2-D MXU dots
            lo = h * D
            qh = seg[:T, lo:lo + D]                       # (T, D)
            kh = seg[:, C + lo:C + lo + D]                # (Sp, D)
            vh = seg[:, 2 * C + lo:2 * C + lo + D]        # (Sp, D)
            s = jax.lax.dot_general(qh, kh, (((1,), (1,)), ((), ())),
                                    preferred_element_type=jnp.float32) * scale
            s = jnp.where(score_mask, NEG_BIG, s)
            p = jnp.exp(s - jnp.max(s, axis=-1, keepdims=True))
            w = p / jnp.sum(p, axis=-1, keepdims=True)    # exact division
            # Per-head memory gate applied to the memory columns of the weights
            # (so a single value matmul covers chunk + gated memory contributions).
            w = jnp.where(mem_col, g[:, h:h + 1] * w, w)
            head_outs.append(jnp.dot(w, vh, preferred_element_type=jnp.float32))
        batch_attn.append(jnp.concatenate(head_outs, axis=1))        # (T, C)

        gs = jnp.sum(g, axis=1, keepdims=True)                        # (T, 1)
        gate_sum = gate_sum + jnp.sum(gs, axis=0, keepdims=True)      # (1, 1)

    attn = jnp.concatenate(batch_attn, axis=0)            # (B*T, C), 8-row aligned concat

    # Canon: causal depth-wise conv1d + residual.  Aligned 8-row zero pad (no odd-size
    # scratch); cross-batch leakage of the shifted taps is masked by the in-batch row id.
    xp = jnp.concatenate([jnp.zeros((8, C), jnp.float32), attn], axis=0)   # (8+BT, C)
    row_ib = jax.lax.broadcasted_iota(jnp.int32, (B, T, C), 1).reshape(BT, C)
    conv = aux[K:K + 1, 0:C]                              # bconv row (broadcasts)
    for j in range(K):
        shift = K - 1 - j
        src = xp[8 - shift:8 - shift + BT, :]             # == attn[t - shift] (zeros above)
        src = jnp.where(row_ib >= shift, src, 0.0)        # kill cross-batch leakage
        conv = conv + aux[j:j + 1, 0:C] * src
    y_all = attn + conv

    # Output projection; single lane-dense store for both batch elements.
    o_ref[...] = jnp.dot(y_all, wo_ref[...], preferred_element_type=jnp.float32)
    reg_ref[...] = gate_sum


# ------------------------------ wrapper --------------------------------------
@jax.jit
def cma_forward(x, forward_memory, ctrl_vec, params):
    B, T, C = x.shape
    H, D = N_HEADS, HEAD_DIM
    M = forward_memory.shape[1]
    K = KSIZE
    Sp = max(8, ((T + M + 7) // 8) * 8)     # sublane-aligned chunk+memory length
    Mp = Sp - T
    NN = 3 * C + H
    scale = 1.0 / math.sqrt(D)
    hp = jax.lax.Precision.HIGHEST

    # query_fusion control injection + gate-bias fold (exact: gate cols of wqkvg = wq@wg).
    ctrl_add = jnp.dot(ctrl_vec, params["wc"], precision=hp)              # (C,)
    bg_eff = params["bg"] + jnp.dot(ctrl_add, params["wg"], precision=hp)  # (H,)
    bias = jnp.concatenate([ctrl_add, jnp.zeros((2 * C,), jnp.float32), bg_eff])

    # Pack every tiny constant into ONE aux slab -> one DMA instead of five.
    aux = jnp.zeros((8, NN), jnp.float32)
    aux = aux.at[0:K, 0:C].set(params["wconv"])
    aux = aux.at[K, 0:C].set(params["bconv"])
    aux = aux.at[K + 1, :].set(bias)

    # Pre-concatenate chunk + zero-padded memory rows (sublane aligned) for both batches.
    mem_p = jnp.pad(forward_memory, ((0, 0), (0, Mp - M), (0, 0)))
    xm = jnp.concatenate([x, mem_p], axis=1).reshape(B * Sp, C)

    kernel = functools.partial(_cma_fused_kernel,
                               B=B, T=T, M=M, Sp=Sp, H=H, D=D, K=K, scale=scale)
    out2d, gsum = pl.pallas_call(
        kernel,
        out_shape=(jax.ShapeDtypeStruct((B * T, C), jnp.float32),
                   jax.ShapeDtypeStruct((1, 1), jnp.float32)),
        grid=(1,),                                       # single step, both batches
        in_specs=[
            pl.BlockSpec((B * Sp, C), lambda i: (0, 0)),   # stacked chunk+memory rows
            pl.BlockSpec((C, NN), lambda i: (0, 0)),       # packed [wq|wk|wv|wq@wg]
            pl.BlockSpec((8, NN), lambda i: (0, 0)),       # aux constants slab
            pl.BlockSpec((C, C), lambda i: (0, 0)),        # wo
        ],
        out_specs=(
            pl.BlockSpec((B * T, C), lambda i: (0, 0)),    # lane-dense output slab
            pl.BlockSpec((1, 1), lambda i: (0, 0)),        # in-kernel gate-sum scalar
        ),
        compiler_params=pltpu.CompilerParams(
            dimension_semantics=("arbitrary",)),           # no cross-TC split (v7x)
    )(xm, params["wqkvg"], aux, params["wo"])

    out = out2d.reshape(B, T, C)
    gate_reg_loss = GATE_REG_STRENGTH * gsum[0, 0] / (B * T * H)   # mean|g| == mean(g)

    # updated_forward_memory / updated_reverse_memory are None (is_memory_update=False)
    # TODO(synk): _update_memory branch not instantiated (is_memory_update=False config).
    return out, None, None, gate_reg_loss


# -------------------------- pure-JAX reference -------------------------------
def reference_forward(x, forward_memory, control_tokens, params):
    with jax.default_matmul_precision("float32"):
        B, T, C = x.shape
        H, D = N_HEADS, HEAD_DIM
        ctrl_vec = jnp.array([control_tokens[kk] for kk in CTRL_KEYS], dtype=x.dtype)
        q = x @ params["wq"] + (ctrl_vec @ params["wc"])[None, None, :]
        k = jnp.concatenate([x @ params["wk"], forward_memory @ params["wk"]], axis=1)
        v = jnp.concatenate([x @ params["wv"], forward_memory @ params["wv"]], axis=1)

        def to_heads(t):
            return t.reshape(B, -1, H, D).transpose(0, 2, 1, 3)

        qh, kh, vh = to_heads(q), to_heads(k), to_heads(v)
        S = kh.shape[2]
        scores = jnp.einsum("bhtd,bhsd->bhts", qh, kh) / math.sqrt(D)
        row = jnp.arange(T)[:, None]
        col = jnp.arange(S)[None, :]
        mask = (col < T) & (col > row)
        scores = jnp.where(mask[None, None], -jnp.inf, scores)
        w = jax.nn.softmax(scores, axis=-1)
        g = jax.nn.sigmoid(q @ params["wg"] + params["bg"]).transpose(0, 2, 1)[..., None]
        y = (jnp.einsum("bhts,bhsd->bhtd", w[..., :T], vh[:, :, :T])
             + g * jnp.einsum("bhts,bhsd->bhtd", w[..., T:], vh[:, :, T:]))
        attn_out = y.transpose(0, 2, 1, 3).reshape(B, T, C)
        xp = jnp.pad(attn_out, ((0, 0), (KSIZE - 1, 0), (0, 0)))
        conv = params["bconv"][None, None, :]
        for j in range(KSIZE):
            conv = conv + params["wconv"][j][None, None, :] * xp[:, j:j + T, :]
        attn_out = attn_out + conv
        out = attn_out @ params["wo"]
        reg = GATE_REG_STRENGTH * jnp.mean(jnp.abs(g))
        return out, reg


# ------------------------------ params ---------------------------------------
def init_params(key):
    ks = jax.random.split(key, 8)
    s = 0.02
    C = EMBED_DIM
    p = {
        "wq": jax.random.normal(ks[0], (C, C), jnp.float32) * s,
        "wk": jax.random.normal(ks[1], (C, C), jnp.float32) * s,
        "wv": jax.random.normal(ks[2], (C, C), jnp.float32) * s,
        "wo": jax.random.normal(ks[3], (C, C), jnp.float32) * s,   # output_proj_zero_init=False
        "wc": jax.random.normal(ks[4], (5, C), jnp.float32) * CTRL_INIT_SCALE,
        "wg": jax.random.normal(ks[5], (C, N_HEADS), jnp.float32) * s,
        "bg": jnp.full((N_HEADS,), GATE_BIAS_INIT, jnp.float32),
        # depthwise conv weights stored tap-major (K, C); PyTorch shape is (C, 1, K)
        "wconv": jax.random.normal(ks[6], (KSIZE, EMBED_DIM), jnp.float32) * 0.1,
        "bconv": jax.random.normal(ks[7], (EMBED_DIM,), jnp.float32) * 0.02,
    }
    # Packed projection prepared once at init: [wq | wk | wv | wq@wg]  -> (C, 3C+H).
    with jax.default_matmul_precision("float32"):
        p["wqkvg"] = jnp.concatenate(
            [p["wq"], p["wk"], p["wv"], p["wq"] @ p["wg"]], axis=1)
    return p


# -------------------------------- main ----------------------------------------
if __name__ == "__main__":
    B, T, M = 2, 8, 4
    key = jax.random.PRNGKey(0)
    kx, kmem, kp = jax.random.split(key, 3)
    x = jax.random.normal(kx, (B, T, EMBED_DIM), jnp.float32)
    forward_memory = jax.random.normal(kmem, (B, M, EMBED_DIM), jnp.float32)
    params = init_params(kp)
    control_tokens = {
        "generation_flag": 1.0,
        "memory_mode_flag": 0.0,
        "memory_usage_ratio": 0.5,
        "memory_density_ratio": 0.25,
        "chunk_position_ratio": 0.75,
    }
    ctrl_vec = jnp.array([control_tokens[kk] for kk in CTRL_KEYS], jnp.float32)

    out, upd_fwd, upd_rev, reg_loss = cma_forward(x, forward_memory, ctrl_vec, params)
    out = jax.block_until_ready(out)
    reg_loss = jax.block_until_ready(reg_loss)

    ref_out, ref_reg = reference_forward(x, forward_memory, control_tokens, params)
    # Exact softmax division (approx reciprocal removed) + f32-precision reference
    # -> much tighter agreement than the previous 1e-3 tolerance.
    assert jnp.allclose(out, ref_out, atol=5e-4, rtol=5e-4), "output mismatch vs reference"
    assert jnp.allclose(reg_loss, ref_reg, atol=1e-5), "gate reg loss mismatch vs reference"
    assert upd_fwd is None and upd_rev is None

    print("KERNEL_OK")
</pallas_src>

<mosaic_0001>
module attributes {stable_mosaic.version = 11 : i64} {
  func.func @_cma_fused_kernel(%arg0: i32, %arg1: memref<32x32xf32, #tpu.memory_space<vmem>>, %arg2: memref<32x100xf32, #tpu.memory_space<vmem>>, %arg3: memref<8x100xf32, #tpu.memory_space<vmem>>, %arg4: memref<32x32xf32, #tpu.memory_space<vmem>>, %arg5: memref<16x32xf32, #tpu.memory_space<vmem>>, %arg6: memref<1x1xf32, #tpu.memory_space<vmem>>) attributes {dimension_semantics = [#tpu.dimension_semantics<arbitrary>], iteration_bounds = array<i64: 1>, scalar_prefetch = 0 : i64, scratch_operands = 0 : i64, tpu.core_type = #tpu.core_type<tc>, window_params = [{pipeline_mode = #tpu.pipeline_mode<synchronous>, transform_indices = @transform_0, window_bounds = array<i64: 32, 32>}, {pipeline_mode = #tpu.pipeline_mode<synchronous>, transform_indices = @transform_1, window_bounds = array<i64: 32, 100>}, {pipeline_mode = #tpu.pipeline_mode<synchronous>, transform_indices = @transform_2, window_bounds = array<i64: 8, 100>}, {pipeline_mode = #tpu.pipeline_mode<synchronous>, transform_indices = @transform_3, window_bounds = array<i64: 32, 32>}, {pipeline_mode = #tpu.pipeline_mode<synchronous>, transform_indices = @transform_4, window_bounds = array<i64: 16, 32>}, {pipeline_mode = #tpu.pipeline_mode<synchronous>, transform_indices = @transform_5, window_bounds = array<i64: 1, 1>}]} {
    %c0 = arith.constant 0 : index
    %c0_0 = arith.constant 0 : index
    %0 = vector.load %arg3[%c0, %c0_0] : memref<8x100xf32, #tpu.memory_space<vmem>>, vector<8x100xf32>
    %1 = vector.extract_strided_slice %0 {offsets = [5, 0], sizes = [1, 100], strides = [1, 1]} : vector<8x100xf32> to vector<1x100xf32>
    %c0_1 = arith.constant 0 : index
    %c0_2 = arith.constant 0 : index
    %2 = vector.load %arg1[%c0_1, %c0_2] : memref<32x32xf32, #tpu.memory_space<vmem>>, vector<32x32xf32>
    %c0_3 = arith.constant 0 : index
    %c0_4 = arith.constant 0 : index
    %3 = vector.load %arg2[%c0_3, %c0_4] : memref<32x100xf32, #tpu.memory_space<vmem>>, vector<32x100xf32>
    %cst = arith.constant dense<0.000000e+00> : vector<32x100xf32>
    %4 = tpu.matmul %2, %3, %cst {dimension_numbers = #tpu.dot_dimension_numbers<[1], [0], [0], [1], [0, 0, 1, 1], [], []>} : vector<32x32xf32>, vector<32x100xf32>, vector<32x100xf32> -> vector<32x100xf32>
    %5 = vector.broadcast %1 : vector<1x100xf32> to vector<32x100xf32>
    %6 = arith.addf %4, %5 : vector<32x100xf32>
    %7 = tpu.iota {dimensions = array<i32: 1>} : vector<8x16xi32>
    %8 = tpu.iota {dimensions = array<i32: 0>} : vector<8x16xi32>
    %c8_i32 = arith.constant 8 : i32
    %9 = vector.broadcast %c8_i32 : i32 to vector<8x16xi32>
    %10 = arith.cmpi slt, %7, %9 : vector<8x16xi32>
    %11 = arith.cmpi sgt, %7, %8 : vector<8x16xi32>
    %12 = arith.andi %10, %11 : vector<8x16xi1>
    %c12_i32 = arith.constant 12 : i32
    %13 = vector.broadcast %c12_i32 : i32 to vector<8x16xi32>
    %14 = arith.cmpi sge, %7, %13 : vector<8x16xi32>
    %15 = arith.ori %12, %14 : vector<8x16xi1>
    %c8_i32_5 = arith.constant 8 : i32
    %16 = vector.broadcast %c8_i32_5 : i32 to vector<8x16xi32>
    %17 = arith.cmpi sge, %7, %16 : vector<8x16xi32>
    %cst_6 = arith.constant 0.000000e+00 : f32
    %18 = vector.broadcast %cst_6 : f32 to vector<1x1xf32>
    %19 = vector.extract_strided_slice %6 {offsets = [0, 0], sizes = [16, 100], strides = [1, 1]} : vector<32x100xf32> to vector<16x100xf32>
    %20 = vector.extract_strided_slice %19 {offsets = [0, 96], sizes = [8, 4], strides = [1, 1]} : vector<16x100xf32> to vector<8x4xf32>
    %21 = arith.negf %20 : vector<8x4xf32>
    %22 = math.exp %21 : vector<8x4xf32>
    %cst_7 = arith.constant 1.000000e+00 : f32
    %23 = vector.broadcast %cst_7 : f32 to vector<8x4xf32>
    %24 = arith.addf %23, %22 : vector<8x4xf32>
    %25 = arith.divf %23, %24 : vector<8x4xf32>
    %26 = vector.extract_strided_slice %19 {offsets = [0, 0], sizes = [8, 8], strides = [1, 1]} : vector<16x100xf32> to vector<8x8xf32>
    %27 = vector.extract_strided_slice %19 {offsets = [0, 32], sizes = [16, 8], strides = [1, 1]} : vector<16x100xf32> to vector<16x8xf32>
    %28 = vector.extract_strided_slice %19 {offsets = [0, 64], sizes = [16, 8], strides = [1, 1]} : vector<16x100xf32> to vector<16x8xf32>
    %cst_8 = arith.constant dense<0.000000e+00> : vector<8x16xf32>
    %29 = tpu.matmul %26, %27, %cst_8 {dimension_numbers = #tpu.dot_dimension_numbers<[1], [1], [0], [0], [0, 0, 1, 0], [], []>} : vector<8x8xf32>, vector<16x8xf32>, vector<8x16xf32> -> vector<8x16xf32>
    %cst_9 = arith.constant 0.353553385 : f32
    %30 = vector.broadcast %cst_9 : f32 to vector<8x16xf32>
    %31 = arith.mulf %29, %30 : vector<8x16xf32>
    %cst_10 = arith.constant -1.000000e+30 : f32
    %32 = vector.broadcast %cst_10 : f32 to vector<8x16xf32>
    %33 = arith.select %15, %32, %31 : vector<8x16xi1>, vector<8x16xf32>
    %cst_11 = arith.constant dense<0xFF800000> : vector<8xf32>
    %34 = vector.multi_reduction <maximumf>, %33, %cst_11 [1] : vector<8x16xf32> to vector<8xf32>
    %35 = vector.shape_cast %34 : vector<8xf32> to vector<8x1xf32>
    %36 = vector.broadcast %35 : vector<8x1xf32> to vector<8x16xf32>
    %37 = arith.subf %33, %36 : vector<8x16xf32>
    %38 = math.exp %37 : vector<8x16xf32>
    %cst_12 = arith.constant dense<0.000000e+00> : vector<8xf32>
    %39 = vector.multi_reduction <add>, %38, %cst_12 [1] : vector<8x16xf32> to vector<8xf32>
    %40 = vector.shape_cast %39 : vector<8xf32> to vector<8x1xf32>
    %41 = vector.broadcast %40 : vector<8x1xf32> to vector<8x16xf32>
    %42 = arith.divf %38, %41 : vector<8x16xf32>
    %43 = vector.extract_strided_slice %25 {offsets = [0, 0], sizes = [8, 1], strides = [1, 1]} : vector<8x4xf32> to vector<8x1xf32>
    %44 = vector.broadcast %43 : vector<8x1xf32> to vector<8x16xf32>
    %45 = arith.mulf %44, %42 : vector<8x16xf32>
    %46 = arith.select %17, %45, %42 : vector<8x16xi1>, vector<8x16xf32>
    %cst_13 = arith.constant dense<0.000000e+00> : vector<8x8xf32>
    %47 = tpu.matmul %46, %28, %cst_13 {dimension_numbers = #tpu.dot_dimension_numbers<[1], [0], [0], [1], [0, 0, 1, 1], [], []>} : vector<8x16xf32>, vector<16x8xf32>, vector<8x8xf32> -> vector<8x8xf32>
    %48 = vector.extract_strided_slice %19 {offsets = [0, 8], sizes = [8, 8], strides = [1, 1]} : vector<16x100xf32> to vector<8x8xf32>
    %49 = vector.extract_strided_slice %19 {offsets = [0, 40], sizes = [16, 8], strides = [1, 1]} : vector<16x100xf32> to vector<16x8xf32>
    %50 = vector.extract_strided_slice %19 {offsets = [0, 72], sizes = [16, 8], strides = [1, 1]} : vector<16x100xf32> to vector<16x8xf32>
    %cst_14 = arith.constant dense<0.000000e+00> : vector<8x16xf32>
    %51 = tpu.matmul %48, %49, %cst_14 {dimension_numbers = #tpu.dot_dimension_numbers<[1], [1], [0], [0], [0, 0, 1, 0], [], []>} : vector<8x8xf32>, vector<16x8xf32>, vector<8x16xf32> -> vector<8x16xf32>
    %cst_15 = arith.constant 0.353553385 : f32
    %52 = vector.broadcast %cst_15 : f32 to vector<8x16xf32>
    %53 = arith.mulf %51, %52 : vector<8x16xf32>
    %cst_16 = arith.constant -1.000000e+30 : f32
    %54 = vector.broadcast %cst_16 : f32 to vector<8x16xf32>
    %55 = arith.select %15, %54, %53 : vector<8x16xi1>, vector<8x16xf32>
    %cst_17 = arith.constant dense<0xFF800000> : vector<8xf32>
    %56 = vector.multi_reduction <maximumf>, %55, %cst_17 [1] : vector<8x16xf32> to vector<8xf32>
    %57 = vector.shape_cast %56 : vector<8xf32> to vector<8x1xf32>
    %58 = vector.broadcast %57 : vector<8x1xf32> to vector<8x16xf32>
    %59 = arith.subf %55, %58 : vector<8x16xf32>
    %60 = math.exp %59 : vector<8x16xf32>
    %cst_18 = arith.constant dense<0.000000e+00> : vector<8xf32>
    %61 = vector.multi_reduction <add>, %60, %cst_18 [1] : vector<8x16xf32> to vector<8xf32>
    %62 = vector.shape_cast %61 : vector<8xf32> to vector<8x1xf32>
    %63 = vector.broadcast %62 : vector<8x1xf32> to vector<8x16xf32>
    %64 = arith.divf %60, %63 : vector<8x16xf32>
    %65 = vector.extract_strided_slice %25 {offsets = [0, 1], sizes = [8, 1], strides = [1, 1]} : vector<8x4xf32> to vector<8x1xf32>
    %66 = vector.broadcast %65 : vector<8x1xf32> to vector<8x16xf32>
    %67 = arith.mulf %66, %64 : vector<8x16xf32>
    %68 = arith.select %17, %67, %64 : vector<8x16xi1>, vector<8x16xf32>
    %cst_19 = arith.constant dense<0.000000e+00> : vector<8x8xf32>
    %69 = tpu.matmul %68, %50, %cst_19 {dimension_numbers = #tpu.dot_dimension_numbers<[1], [0], [0], [1], [0, 0, 1, 1], [], []>} : vector<8x16xf32>, vector<16x8xf32>, vector<8x8xf32> -> vector<8x8xf32>
    %70 = vector.extract_strided_slice %19 {offsets = [0, 16], sizes = [8, 8], strides = [1, 1]} : vector<16x100xf32> to vector<8x8xf32>
    %71 = vector.extract_strided_slice %19 {offsets = [0, 48], sizes = [16, 8], strides = [1, 1]} : vector<16x100xf32> to vector<16x8xf32>
    %72 = vector.extract_strided_slice %19 {offsets = [0, 80], sizes = [16, 8], strides = [1, 1]} : vector<16x100xf32> to vector<16x8xf32>
    %cst_20 = arith.constant dense<0.000000e+00> : vector<8x16xf32>
    %73 = tpu.matmul %70, %71, %cst_20 {dimension_numbers = #tpu.dot_dimension_numbers<[1], [1], [0], [0], [0, 0, 1, 0], [], []>} : vector<8x8xf32>, vector<16x8xf32>, vector<8x16xf32> -> vector<8x16xf32>
    %cst_21 = arith.constant 0.353553385 : f32
    %74 = vector.broadcast %cst_21 : f32 to vector<8x16xf32>
    %75 = arith.mulf %73, %74 : vector<8x16xf32>
    %cst_22 = arith.constant -1.000000e+30 : f32
    %76 = vector.broadcast %cst_22 : f32 to vector<8x16xf32>
    %77 = arith.select %15, %76, %75 : vector<8x16xi1>, vector<8x16xf32>
    %cst_23 = arith.constant dense<0xFF800000> : vector<8xf32>
    %78 = vector.multi_reduction <maximumf>, %77, %cst_23 [1] : vector<8x16xf32> to vector<8xf32>
    %79 = vector.shape_cast %78 : vector<8xf32> to vector<8x1xf32>
    %80 = vector.broadcast %79 : vector<8x1xf32> to vector<8x16xf32>
    %81 = arith.subf %77, %80 : vector<8x16xf32>
    %82 = math.exp %81 : vector<8x16xf32>
    %cst_24 = arith.constant dense<0.000000e+00> : vector<8xf32>
    %83 = vector.multi_reduction <add>, %82, %cst_24 [1] : vector<8x16xf32> to vector<8xf32>
    %84 = vector.shape_cast %83 : vector<8xf32> to vector<8x1xf32>
    %85 = vector.broadcast %84 : vector<8x1xf32> to vector<8x16xf32>
    %86 = arith.divf %82, %85 : vector<8x16xf32>
    %87 = vector.extract_strided_slice %25 {offsets = [0, 2], sizes = [8, 1], strides = [1, 1]} : vector<8x4xf32> to vector<8x1xf32>
    %88 = vector.broadcast %87 : vector<8x1xf32> to vector<8x16xf32>
    %89 = arith.mulf %88, %86 : vector<8x16xf32>
    %90 = arith.select %17, %89, %86 : vector<8x16xi1>, vector<8x16xf32>
    %cst_25 = arith.constant dense<0.000000e+00> : vector<8x8xf32>
    %91 = tpu.matmul %90, %72, %cst_25 {dimension_numbers = #tpu.dot_dimension_numbers<[1], [0], [0], [1], [0, 0, 1, 1], [], []>} : vector<8x16xf32>, vector<16x8xf32>, vector<8x8xf32> -> vector<8x8xf32>
    %92 = vector.extract_strided_slice %19 {offsets = [0, 24], sizes = [8, 8], strides = [1, 1]} : vector<16x100xf32> to vector<8x8xf32>
    %93 = vector.extract_strided_slice %19 {offsets = [0, 56], sizes = [16, 8], strides = [1, 1]} : vector<16x100xf32> to vector<16x8xf32>
    %94 = vector.extract_strided_slice %19 {offsets = [0, 88], sizes = [16, 8], strides = [1, 1]} : vector<16x100xf32> to vector<16x8xf32>
    %cst_26 = arith.constant dense<0.000000e+00> : vector<8x16xf32>
    %95 = tpu.matmul %92, %93, %cst_26 {dimension_numbers = #tpu.dot_dimension_numbers<[1], [1], [0], [0], [0, 0, 1, 0], [], []>} : vector<8x8xf32>, vector<16x8xf32>, vector<8x16xf32> -> vector<8x16xf32>
    %cst_27 = arith.constant 0.353553385 : f32
    %96 = vector.broadcast %cst_27 : f32 to vector<8x16xf32>
    %97 = arith.mulf %95, %96 : vector<8x16xf32>
    %cst_28 = arith.constant -1.000000e+30 : f32
    %98 = vector.broadcast %cst_28 : f32 to vector<8x16xf32>
    %99 = arith.select %15, %98, %97 : vector<8x16xi1>, vector<8x16xf32>
    %cst_29 = arith.constant dense<0xFF800000> : vector<8xf32>
    %100 = vector.multi_reduction <maximumf>, %99, %cst_29 [1] : vector<8x16xf32> to vector<8xf32>
    %101 = vector.shape_cast %100 : vector<8xf32> to vector<8x1xf32>
    %102 = vector.broadcast %101 : vector<8x1xf32> to vector<8x16xf32>
    %103 = arith.subf %99, %102 : vector<8x16xf32>
    %104 = math.exp %103 : vector<8x16xf32>
    %cst_30 = arith.constant dense<0.000000e+00> : vector<8xf32>
    %105 = vector.multi_reduction <add>, %104, %cst_30 [1] : vector<8x16xf32> to vector<8xf32>
    %106 = vector.shape_cast %105 : vector<8xf32> to vector<8x1xf32>
    %107 = vector.broadcast %106 : vector<8x1xf32> to vector<8x16xf32>
    %108 = arith.divf %104, %107 : vector<8x16xf32>
    %109 = vector.extract_strided_slice %25 {offsets = [0, 3], sizes = [8, 1], strides = [1, 1]} : vector<8x4xf32> to vector<8x1xf32>
    %110 = vector.broadcast %109 : vector<8x1xf32> to vector<8x16xf32>
    %111 = arith.mulf %110, %108 : vector<8x16xf32>
    %112 = arith.select %17, %111, %108 : vector<8x16xi1>, vector<8x16xf32>
    %cst_31 = arith.constant dense<0.000000e+00> : vector<8x8xf32>
    %113 = tpu.matmul %112, %94, %cst_31 {dimension_numbers = #tpu.dot_dimension_numbers<[1], [0], [0], [1], [0, 0, 1, 1], [], []>} : vector<8x16xf32>, vector<16x8xf32>, vector<8x8xf32> -> vector<8x8xf32>
    %114 = tpu.concatenate %47, %69, %91, %113 in 1 : vector<8x8xf32>, vector<8x8xf32>, vector<8x8xf32>, vector<8x8xf32> -> vector<8x32xf32>
    %cst_32 = arith.constant dense<0.000000e+00> : vector<8xf32>
    %115 = vector.multi_reduction <add>, %25, %cst_32 [1] : vector<8x4xf32> to vector<8xf32>
    %116 = vector.shape_cast %115 : vector<8xf32> to vector<8x1xf32>
    %cst_33 = arith.constant dense<0.000000e+00> : vector<1xf32>
    %117 = vector.multi_reduction <add>, %116, %cst_33 [0] : vector<8x1xf32> to vector<1xf32>
    %118 = vector.shape_cast %117 : vector<1xf32> to vector<1x1xf32>
    %119 = arith.addf %18, %118 : vector<1x1xf32>
    %120 = vector.extract_strided_slice %6 {offsets = [16, 0], sizes = [16, 100], strides = [1, 1]} : vector<32x100xf32> to vector<16x100xf32>
    %121 = vector.extract_strided_slice %120 {offsets = [0, 96], sizes = [8, 4], strides = [1, 1]} : vector<16x100xf32> to vector<8x4xf32>
    %122 = arith.negf %121 : vector<8x4xf32>
    %123 = math.exp %122 : vector<8x4xf32>
    %cst_34 = arith.constant 1.000000e+00 : f32
    %124 = vector.broadcast %cst_34 : f32 to vector<8x4xf32>
    %125 = arith.addf %124, %123 : vector<8x4xf32>
    %126 = arith.divf %124, %125 : vector<8x4xf32>
    %127 = vector.extract_strided_slice %120 {offsets = [0, 0], sizes = [8, 8], strides = [1, 1]} : vector<16x100xf32> to vector<8x8xf32>
    %128 = vector.extract_strided_slice %120 {offsets = [0, 32], sizes = [16, 8], strides = [1, 1]} : vector<16x100xf32> to vector<16x8xf32>
    %129 = vector.extract_strided_slice %120 {offsets = [0, 64], sizes = [16, 8], strides = [1, 1]} : vector<16x100xf32> to vector<16x8xf32>
    %cst_35 = arith.constant dense<0.000000e+00> : vector<8x16xf32>
    %130 = tpu.matmul %127, %128, %cst_35 {dimension_numbers = #tpu.dot_dimension_numbers<[1], [1], [0], [0], [0, 0, 1, 0], [], []>} : vector<8x8xf32>, vector<16x8xf32>, vector<8x16xf32> -> vector<8x16xf32>
    %cst_36 = arith.constant 0.353553385 : f32
    %131 = vector.broadcast %cst_36 : f32 to vector<8x16xf32>
    %132 = arith.mulf %130, %131 : vector<8x16xf32>
    %cst_37 = arith.constant -1.000000e+30 : f32
    %133 = vector.broadcast %cst_37 : f32 to vector<8x16xf32>
    %134 = arith.select %15, %133, %132 : vector<8x16xi1>, vector<8x16xf32>
    %cst_38 = arith.constant dense<0xFF800000> : vector<8xf32>
    %135 = vector.multi_reduction <maximumf>, %134, %cst_38 [1] : vector<8x16xf32> to vector<8xf32>
    %136 = vector.shape_cast %135 : vector<8xf32> to vector<8x1xf32>
    %137 = vector.broadcast %136 : vector<8x1xf32> to vector<8x16xf32>
    %138 = arith.subf %134, %137 : vector<8x16xf32>
    %139 = math.exp %138 : vector<8x16xf32>
    %cst_39 = arith.constant dense<0.000000e+00> : vector<8xf32>
    %140 = vector.multi_reduction <add>, %139, %cst_39 [1] : vector<8x16xf32> to vector<8xf32>
    %141 = vector.shape_cast %140 : vector<8xf32> to vector<8x1xf32>
    %142 = vector.broadcast %141 : vector<8x1xf32> to vector<8x16xf32>
    %143 = arith.divf %139, %142 : vector<8x16xf32>
    %144 = vector.extract_strided_slice %126 {offsets = [0, 0], sizes = [8, 1], strides = [1, 1]} : vector<8x4xf32> to vector<8x1xf32>
    %145 = vector.broadcast %144 : vector<8x1xf32> to vector<8x16xf32>
    %146 = arith.mulf %145, %143 : vector<8x16xf32>
    %147 = arith.select %17, %146, %143 : vector<8x16xi1>, vector<8x16xf32>
    %cst_40 = arith.constant dense<0.000000e+00> : vector<8x8xf32>
    %148 = tpu.matmul %147, %129, %cst_40 {dimension_numbers = #tpu.dot_dimension_numbers<[1], [0], [0], [1], [0, 0, 1, 1], [], []>} : vector<8x16xf32>, vector<16x8xf32>, vector<8x8xf32> -> vector<8x8xf32>
    %149 = vector.extract_strided_slice %120 {offsets = [0, 8], sizes = [8, 8], strides = [1, 1]} : vector<16x100xf32> to vector<8x8xf32>
    %150 = vector.extract_strided_slice %120 {offsets = [0, 40], sizes = [16, 8], strides = [1, 1]} : vector<16x100xf32> to vector<16x8xf32>
    %151 = vector.extract_strided_slice %120 {offsets = [0, 72], sizes = [16, 8], strides = [1, 1]} : vector<16x100xf32> to vector<16x8xf32>
    %cst_41 = arith.constant dense<0.000000e+00> : vector<8x16xf32>
    %152 = tpu.matmul %149, %150, %cst_41 {dimension_numbers = #tpu.dot_dimension_numbers<[1], [1], [0], [0], [0, 0, 1, 0], [], []>} : vector<8x8xf32>, vector<16x8xf32>, vector<8x16xf32> -> vector<8x16xf32>
    %cst_42 = arith.constant 0.353553385 : f32
    %153 = vector.broadcast %cst_42 : f32 to vector<8x16xf32>
    %154 = arith.mulf %152, %153 : vector<8x16xf32>
    %cst_43 = arith.constant -1.000000e+30 : f32
    %155 = vector.broadcast %cst_43 : f32 to vector<8x16xf32>
    %156 = arith.select %15, %155, %154 : vector<8x16xi1>, vector<8x16xf32>
    %cst_44 = arith.constant dense<0xFF800000> : vector<8xf32>
    %157 = vector.multi_reduction <maximumf>, %156, %cst_44 [1] : vector<8x16xf32> to vector<8xf32>
    %158 = vector.shape_cast %157 : vector<8xf32> to vector<8x1xf32>
    %159 = vector.broadcast %158 : vector<8x1xf32> to vector<8x16xf32>
    %160 = arith.subf %156, %159 : vector<8x16xf32>
    %161 = math.exp %160 : vector<8x16xf32>
    %cst_45 = arith.constant dense<0.000000e+00> : vector<8xf32>
    %162 = vector.multi_reduction <add>, %161, %cst_45 [1] : vector<8x16xf32> to vector<8xf32>
    %163 = vector.shape_cast %162 : vector<8xf32> to vector<8x1xf32>
    %164 = vector.broadcast %163 : vector<8x1xf32> to vector<8x16xf32>
    %165 = arith.divf %161, %164 : vector<8x16xf32>
    %166 = vector.extract_strided_slice %126 {offsets = [0, 1], sizes = [8, 1], strides = [1, 1]} : vector<8x4xf32> to vector<8x1xf32>
    %167 = vector.broadcast %166 : vector<8x1xf32> to vector<8x16xf32>
    %168 = arith.mulf %167, %165 : vector<8x16xf32>
    %169 = arith.select %17, %168, %165 : vector<8x16xi1>, vector<8x16xf32>
    %cst_46 = arith.constant dense<0.000000e+00> : vector<8x8xf32>
    %170 = tpu.matmul %169, %151, %cst_46 {dimension_numbers = #tpu.dot_dimension_numbers<[1], [0], [0], [1], [0, 0, 1, 1], [], []>} : vector<8x16xf32>, vector<16x8xf32>, vector<8x8xf32> -> vector<8x8xf32>
    %171 = vector.extract_strided_slice %120 {offsets = [0, 16], sizes = [8, 8], strides = [1, 1]} : vector<16x100xf32> to vector<8x8xf32>
    %172 = vector.extract_strided_slice %120 {offsets = [0, 48], sizes = [16, 8], strides = [1, 1]} : vector<16x100xf32> to vector<16x8xf32>
    %173 = vector.extract_strided_slice %120 {offsets = [0, 80], sizes = [16, 8], strides = [1, 1]} : vector<16x100xf32> to vector<16x8xf32>
    %cst_47 = arith.constant dense<0.000000e+00> : vector<8x16xf32>
    %174 = tpu.matmul %171, %172, %cst_47 {dimension_numbers = #tpu.dot_dimension_numbers<[1], [1], [0], [0], [0, 0, 1, 0], [], []>} : vector<8x8xf32>, vector<16x8xf32>, vector<8x16xf32> -> vector<8x16xf32>
    %cst_48 = arith.constant 0.353553385 : f32
    %175 = vector.broadcast %cst_48 : f32 to vector<8x16xf32>
    %176 = arith.mulf %174, %175 : vector<8x16xf32>
    %cst_49 = arith.constant -1.000000e+30 : f32
    %177 = vector.broadcast %cst_49 : f32 to vector<8x16xf32>
    %178 = arith.select %15, %177, %176 : vector<8x16xi1>, vector<8x16xf32>
    %cst_50 = arith.constant dense<0xFF800000> : vector<8xf32>
    %179 = vector.multi_reduction <maximumf>, %178, %cst_50 [1] : vector<8x16xf32> to vector<8xf32>
    %180 = vector.shape_cast %179 : vector<8xf32> to vector<8x1xf32>
    %181 = vector.broadcast %180 : vector<8x1xf32> to vector<8x16xf32>
    %182 = arith.subf %178, %181 : vector<8x16xf32>
    %183 = math.exp %182 : vector<8x16xf32>
    %cst_51 = arith.constant dense<0.000000e+00> : vector<8xf32>
    %184 = vector.multi_reduction <add>, %183, %cst_51 [1] : vector<8x16xf32> to vector<8xf32>
    %185 = vector.shape_cast %184 : vector<8xf32> to vector<8x1xf32>
    %186 = vector.broadcast %185 : vector<8x1xf32> to vector<8x16xf32>
    %187 = arith.divf %183, %186 : vector<8x16xf32>
    %188 = vector.extract_strided_slice %126 {offsets = [0, 2], sizes = [8, 1], strides = [1, 1]} : vector<8x4xf32> to vector<8x1xf32>
    %189 = vector.broadcast %188 : vector<8x1xf32> to vector<8x16xf32>
    %190 = arith.mulf %189, %187 : vector<8x16xf32>
    %191 = arith.select %17, %190, %187 : vector<8x16xi1>, vector<8x16xf32>
    %cst_52 = arith.constant dense<0.000000e+00> : vector<8x8xf32>
    %192 = tpu.matmul %191, %173, %cst_52 {dimension_numbers = #tpu.dot_dimension_numbers<[1], [0], [0], [1], [0, 0, 1, 1], [], []>} : vector<8x16xf32>, vector<16x8xf32>, vector<8x8xf32> -> vector<8x8xf32>
    %193 = vector.extract_strided_slice %120 {offsets = [0, 24], sizes = [8, 8], strides = [1, 1]} : vector<16x100xf32> to vector<8x8xf32>
    %194 = vector.extract_strided_slice %120 {offsets = [0, 56], sizes = [16, 8], strides = [1, 1]} : vector<16x100xf32> to vector<16x8xf32>
    %195 = vector.extract_strided_slice %120 {offsets = [0, 88], sizes = [16, 8], strides = [1, 1]} : vector<16x100xf32> to vector<16x8xf32>
    %cst_53 = arith.constant dense<0.000000e+00> : vector<8x16xf32>
    %196 = tpu.matmul %193, %194, %cst_53 {dimension_numbers = #tpu.dot_dimension_numbers<[1], [1], [0], [0], [0, 0, 1, 0], [], []>} : vector<8x8xf32>, vector<16x8xf32>, vector<8x16xf32> -> vector<8x16xf32>
    %cst_54 = arith.constant 0.353553385 : f32
    %197 = vector.broadcast %cst_54 : f32 to vector<8x16xf32>
    %198 = arith.mulf %196, %197 : vector<8x16xf32>
    %cst_55 = arith.constant -1.000000e+30 : f32
    %199 = vector.broadcast %cst_55 : f32 to vector<8x16xf32>
    %200 = arith.select %15, %199, %198 : vector<8x16xi1>, vector<8x16xf32>
    %cst_56 = arith.constant dense<0xFF800000> : vector<8xf32>
    %201 = vector.multi_reduction <maximumf>, %200, %cst_56 [1] : vector<8x16xf32> to vector<8xf32>
    %202 = vector.shape_cast %201 : vector<8xf32> to vector<8x1xf32>
    %203 = vector.broadcast %202 : vector<8x1xf32> to vector<8x16xf32>
    %204 = arith.subf %200, %203 : vector<8x16xf32>
    %205 = math.exp %204 : vector<8x16xf32>
    %cst_57 = arith.constant dense<0.000000e+00> : vector<8xf32>
    %206 = vector.multi_reduction <add>, %205, %cst_57 [1] : vector<8x16xf32> to vector<8xf32>
    %207 = vector.shape_cast %206 : vector<8xf32> to vector<8x1xf32>
    %208 = vector.broadcast %207 : vector<8x1xf32> to vector<8x16xf32>
    %209 = arith.divf %205, %208 : vector<8x16xf32>
    %210 = vector.extract_strided_slice %126 {offsets = [0, 3], sizes = [8, 1], strides = [1, 1]} : vector<8x4xf32> to vector<8x1xf32>
    %211 = vector.broadcast %210 : vector<8x1xf32> to vector<8x16xf32>
    %212 = arith.mulf %211, %209 : vector<8x16xf32>
    %213 = arith.select %17, %212, %209 : vector<8x16xi1>, vector<8x16xf32>
    %cst_58 = arith.constant dense<0.000000e+00> : vector<8x8xf32>
    %214 = tpu.matmul %213, %195, %cst_58 {dimension_numbers = #tpu.dot_dimension_numbers<[1], [0], [0], [1], [0, 0, 1, 1], [], []>} : vector<8x16xf32>, vector<16x8xf32>, vector<8x8xf32> -> vector<8x8xf32>
    %215 = tpu.concatenate %148, %170, %192, %214 in 1 : vector<8x8xf32>, vector<8x8xf32>, vector<8x8xf32>, vector<8x8xf32> -> vector<8x32xf32>
    %cst_59 = arith.constant dense<0.000000e+00> : vector<8xf32>
    %216 = vector.multi_reduction <add>, %126, %cst_59 [1] : vector<8x4xf32> to vector<8xf32>
    %217 = vector.shape_cast %216 : vector<8xf32> to vector<8x1xf32>
    %cst_60 = arith.constant dense<0.000000e+00> : vector<1xf32>
    %218 = vector.multi_reduction <add>, %217, %cst_60 [0] : vector<8x1xf32> to vector<1xf32>
    %219 = vector.shape_cast %218 : vector<1xf32> to vector<1x1xf32>
    %220 = arith.addf %119, %219 : vector<1x1xf32>
    %221 = tpu.concatenate %114, %215 in 0 : vector<8x32xf32>, vector<8x32xf32> -> vector<16x32xf32>
    %cst_61 = arith.constant 0.000000e+00 : f32
    %222 = vector.broadcast %cst_61 : f32 to vector<8x32xf32>
    %223 = tpu.concatenate %222, %221 in 0 : vector<8x32xf32>, vector<16x32xf32> -> vector<24x32xf32>
    %224 = tpu.iota {dimensions = array<i32: 1>} : vector<2x8x32xi32>
    %225 = vector.shape_cast %224 : vector<2x8x32xi32> to vector<16x32xi32>
    %226 = vector.extract_strided_slice %0 {offsets = [4, 0], sizes = [1, 32], strides = [1, 1]} : vector<8x100xf32> to vector<1x32xf32>
    %227 = vector.extract_strided_slice %223 {offsets = [5, 0], sizes = [16, 32], strides = [1, 1]} : vector<24x32xf32> to vector<16x32xf32>
    %c3_i32 = arith.constant 3 : i32
    %228 = vector.broadcast %c3_i32 : i32 to vector<16x32xi32>
    %229 = arith.cmpi sge, %225, %228 : vector<16x32xi32>
    %cst_62 = arith.constant 0.000000e+00 : f32
    %230 = vector.broadcast %cst_62 : f32 to vector<16x32xf32>
    %231 = arith.select %229, %227, %230 : vector<16x32xi1>, vector<16x32xf32>
    %232 = vector.extract_strided_slice %0 {offsets = [0, 0], sizes = [1, 32], strides = [1, 1]} : vector<8x100xf32> to vector<1x32xf32>
    %233 = vector.broadcast %232 : vector<1x32xf32> to vector<16x32xf32>
    %234 = arith.mulf %233, %231 : vector<16x32xf32>
    %235 = vector.broadcast %226 : vector<1x32xf32> to vector<16x32xf32>
    %236 = arith.addf %235, %234 : vector<16x32xf32>
    %237 = vector.extract_strided_slice %223 {offsets = [6, 0], sizes = [16, 32], strides = [1, 1]} : vector<24x32xf32> to vector<16x32xf32>
    %c2_i32 = arith.constant 2 : i32
    %238 = vector.broadcast %c2_i32 : i32 to vector<16x32xi32>
    %239 = arith.cmpi sge, %225, %238 : vector<16x32xi32>
    %cst_63 = arith.constant 0.000000e+00 : f32
    %240 = vector.broadcast %cst_63 : f32 to vector<16x32xf32>
    %241 = arith.select %239, %237, %240 : vector<16x32xi1>, vector<16x32xf32>
    %242 = vector.extract_strided_slice %0 {offsets = [1, 0], sizes = [1, 32], strides = [1, 1]} : vector<8x100xf32> to vector<1x32xf32>
    %243 = vector.broadcast %242 : vector<1x32xf32> to vector<16x32xf32>
    %244 = arith.mulf %243, %241 : vector<16x32xf32>
    %245 = arith.addf %236, %244 : vector<16x32xf32>
    %246 = vector.extract_strided_slice %223 {offsets = [7, 0], sizes = [16, 32], strides = [1, 1]} : vector<24x32xf32> to vector<16x32xf32>
    %c1_i32 = arith.constant 1 : i32
    %247 = vector.broadcast %c1_i32 : i32 to vector<16x32xi32>
    %248 = arith.cmpi sge, %225, %247 : vector<16x32xi32>
    %cst_64 = arith.constant 0.000000e+00 : f32
    %249 = vector.broadcast %cst_64 : f32 to vector<16x32xf32>
    %250 = arith.select %248, %246, %249 : vector<16x32xi1>, vector<16x32xf32>
    %251 = vector.extract_strided_slice %0 {offsets = [2, 0], sizes = [1, 32], strides = [1, 1]} : vector<8x100xf32> to vector<1x32xf32>
    %252 = vector.broadcast %251 : vector<1x32xf32> to vector<16x32xf32>
    %253 = arith.mulf %252, %250 : vector<16x32xf32>
    %254 = arith.addf %245, %253 : vector<16x32xf32>
    %255 = vector.extract_strided_slice %223 {offsets = [8, 0], sizes = [16, 32], strides = [1, 1]} : vector<24x32xf32> to vector<16x32xf32>
    %c0_i32 = arith.constant 0 : i32
    %256 = vector.broadcast %c0_i32 : i32 to vector<16x32xi32>
    %257 = arith.cmpi sge, %225, %256 : vector<16x32xi32>
    %cst_65 = arith.constant 0.000000e+00 : f32
    %258 = vector.broadcast %cst_65 : f32 to vector<16x32xf32>
    %259 = arith.select %257, %255, %258 : vector<16x32xi1>, vector<16x32xf32>
    %260 = vector.extract_strided_slice %0 {offsets = [3, 0], sizes = [1, 32], strides = [1, 1]} : vector<8x100xf32> to vector<1x32xf32>
    %261 = vector.broadcast %260 : vector<1x32xf32> to vector<16x32xf32>
    %262 = arith.mulf %261, %259 : vector<16x32xf32>
    %263 = arith.addf %254, %262 : vector<16x32xf32>
    %264 = arith.addf %221, %263 : vector<16x32xf32>
    %c0_66 = arith.constant 0 : index
    %c0_67 = arith.constant 0 : index
    %265 = vector.load %arg4[%c0_66, %c0_67] : memref<32x32xf32, #tpu.memory_space<vmem>>, vector<32x32xf32>
    %cst_68 = arith.constant dense<0.000000e+00> : vector<16x32xf32>
    %266 = tpu.matmul %264, %265, %cst_68 {dimension_numbers = #tpu.dot_dimension_numbers<[1], [0], [0], [1], [0, 0, 1, 1], [], []>} : vector<16x32xf32>, vector<32x32xf32>, vector<16x32xf32> -> vector<16x32xf32>
    %c0_69 = arith.constant 0 : index
    %c0_70 = arith.constant 0 : index
    %267 = vector.load %arg5[%c0_69, %c0_70] : memref<16x32xf32, #tpu.memory_space<vmem>>, vector<16x32xf32>
    tpu.vector_store %arg5[%c0_69, %c0_70], %266 {strides = array<i32>} : memref<16x32xf32, #tpu.memory_space<vmem>>, vector<16x32xf32>,
    %c0_71 = arith.constant 0 : index
    %c0_72 = arith.constant 0 : index
    %268 = vector.load %arg6[%c0_71, %c0_72] : memref<1x1xf32, #tpu.memory_space<vmem>>, vector<1x1xf32>
    tpu.vector_store %arg6[%c0_71, %c0_72], %220 {strides = array<i32>} : memref<1x1xf32, #tpu.memory_space<vmem>>, vector<1x1xf32>,
    return
  }
  func.func @transform_0(%arg0: i32) -> (i32, i32) {
    %c0_i32 = arith.constant 0 : i32
    %c0_i32_0 = arith.constant 0 : i32
    %c0_i32_1 = arith.constant 0 : i32
    return %c0_i32, %c0_i32_0 : i32, i32
  }
  func.func @transform_1(%arg0: i32) -> (i32, i32) {
    %c0_i32 = arith.constant 0 : i32
    %c0_i32_0 = arith.constant 0 : i32
    %c0_i32_1 = arith.constant 0 : i32
    return %c0_i32, %c0_i32_0 : i32, i32
  }
  func.func @transform_2(%arg0: i32) -> (i32, i32) {
    %c0_i32 = arith.constant 0 : i32
    %c0_i32_0 = arith.constant 0 : i32
    %c0_i32_1 = arith.constant 0 : i32
    return %c0_i32, %c0_i32_0 : i32, i32
  }
  func.func @transform_3(%arg0: i32) -> (i32, i32) {
    %c0_i32 = arith.constant 0 : i32
    %c0_i32_0 = arith.constant 0 : i32
    %c0_i32_1 = arith.constant 0 : i32
    return %c0_i32, %c0_i32_0 : i32, i32
  }
  func.func @transform_4(%arg0: i32) -> (i32, i32) {
    %c0_i32 = arith.constant 0 : i32
    %c0_i32_0 = arith.constant 0 : i32
    %c0_i32_1 = arith.constant 0 : i32
    return %c0_i32, %c0_i32_0 : i32, i32
  }
  func.func @transform_5(%arg0: i32) -> (i32, i32) {
    %c0_i32 = arith.constant 0 : i32
    %c0_i32_0 = arith.constant 0 : i32
    %c0_i32_1 = arith.constant 0 : i32
    return %c0_i32, %c0_i32_0 : i32, i32
  }
}

</mosaic_0001>

<bundles_post_ra>
// kernel: cma_forward.1
= control target key start
LH: loop header
LB: loop body
LE: loop exit
PB: predicated region body
PF: predicated region fallthrough
CT: control target
= control target key end

     0   :  { %11 = vsyncpa [#allocation3], 0  ;;  %vm34_vm0 = vcmask 261120   ;;  %s2791_s0 = inlined_call_operand.vmem [shape: f32[32,32], index: 0, kind: input, shape index: {}]   ;;  %s2792_s1 = inlined_call_operand.vmem [shape: f32[32,100], index: 1, kind: input, shape index: {}]   ;;  %s2793_s2 = inlined_call_operand.vmem [shape: f32[8,100], index: 2, kind: input, shape index: {}]   ;;  %s2794_s3 = inlined_call_operand.vmem [shape: f32[32,32], index: 3, kind: input, shape index: {}]   ;;  %s2795_s4 = inlined_call_operand.hbm [shape: f32[16,32], index: 4, kind: output, shape index: {0}]   ;;  %s2796_s5 = inlined_call_operand.hbm [shape: f32[1,1], index: 5, kind: output, shape index: {1}]  }
   0x1   :  { %v26_v0 = vld [vmem:[%s2792_s1] sm:$0xff]  ;;  %v27_v1 = vld [vmem:[%s2792_s1 + $0x8] sm:$0xff]  ;;  %v28_v2 = vld [vmem:[%s2792_s1 + $0x10] sm:$0xff] }
   0x2   :  { %v2091_v3 = vpack.c.bf16 %v27_v1, %v26_v0  ;;  %v29_v4 = vld [vmem:[%s2792_s1 + $0x18] sm:$0xff]  ;;  %v22_v5 = vld [vmem:[%s2791_s0] sm:$0xff] }
   0x3   :  { %v2095_v6 = vpack.c.bf16 %v29_v4, %v28_v2  ;;  %1962 = vmatprep.mubr.msk.f32.mxu0 %vm34_vm0, %v22_v5 }
   0x4   :  { %12 = vsyncpa [#allocation5], 0  ;;  %2092 = vmatprep.subr.bf16.mxu0 %v2091_v3  ;;  %v23_v7 = vld [vmem:[%s2791_s0 + $0x8] sm:$0xff]  ;;  %v30_v8 = vlaneseq  ;;  %v2445_v11 = vld [vmem:[%s2793_s2] sm:$0xff]  ;;  %v2364_v12 = vmov 0.0|0.0   ;;  %vm2365_vm1 = vmmov 0  }
   0x5   :  { %2094 = vmatpush3.bf16.msra.mxu0 %v2091_v3  ;;  %2099 = vmatprep.subr.bf16.mxu1 %v2364_v12  ;;  %v24_v17 = vld [vmem:[%s2791_s0 + $0x10] sm:$0xff]  ;;  %v25_v18 = vld [vmem:[%s2791_s0 + $0x18] sm:$0xff]  ;;  %v2366_v20 = vmov 0.0   ;;  %s2367_s2 = smov 120   ;;  %s2368_s0 = smov 96   ;;  %vm154_vm2 = vcmask 64512  }
   0x6   :  { %2096 = vmatprep.subr.bf16.mxu0 %v2095_v6  ;;  %v2439_v9 = vshrl.u32 %v30_v8, 7  ;;  %1972 = vmatprep.mubr.msk.f32.mxu1 %vm2365_vm1, %v2366_v20  ;;  %s2369_s10 = smov 80   ;;  %s2370_s11 = smov 88   ;;  %vm2483_vm3 = vmpackc.low %vm154_vm2, %vm154_vm2  ;;  %v2510_v39 = vand.u32 127, %v30_v8  ;;  %vm233_vm9 = vcmask 130048   ;;  %v2372_v56 = vmov 97  }
   0x7   :  { %s2371_s12 = smov 112   ;;  %2209 = vset.pattern.permute.xlu1 %v2372_v56  ;;  %v2373_v57 = vmov 96   ;;  %s2374_s13 = smov 64   ;;  %v2376_v8 = vmov 98   ;;  %vm885_vm11 = vcmask 195584   ;;  %vm1660_vm13 = vcmask 1042432  }
   0x8   :  { %v32_v10 = vsub.s32 5, %v2439_v9  ;;  %vm136_vm4 = vcmp.lt.s32.totalorder %v2510_v39, 8  ;;  %vm137_vm5 = vcmp.gt.s32.totalorder %v2510_v39, %v2439_v9  ;;  %vm139_vm7 = vcmp.ge.s32.totalorder %v2510_v39, 12  ;;  %2203 = vset.pattern.permute.xlu0 %v2373_v57  ;;  %s2375_s14 = smov 56   ;;  %s2377_s15 = smov 48  }
   0x9   :  { %2098 = vmatpush3.bf16.msra.mxu0 %v2095_v6  ;;  %vm138_vm6 = vmand %vm136_vm4, %vm137_vm5  ;;  %s2378_s16 = smov 72   ;;  %s2379_s17 = smov 104   ;;  %vm141_vm10 = vcmp.ge.s32.totalorder %v2510_v39, 8  ;;  %vm1656_vm12 = vcmp.ge.s32.totalorder %v2439_v9, 3  ;;  %vm1682_vm14 = vcmp.ge.s32.totalorder %v2439_v9, 2  ;;  %v1695_v39 = vsub.s32 1, %v2439_v9 }
   0xa   :  { %2106 = vmatprep.subr.bf16.mxu0 %v2364_v12  ;;  %v2450_v13 = vrot.slane %v2445_v11, %v32_v10  ;;  %vm2516_vm8 = vmor %vm138_vm6, %vm139_vm7  ;;  %s2381_s18 = smov 40   ;;  %s2382_s19 = smov 8   ;;  %vm1683_vm15 = vcmask 1041408   ;;  %vm1820_vm4 = vcmask 0  }
   0xb   :  { %s2383_s20 = smov 16   ;;  %s2384_s21 = smov 24  }
   0xc   :  { %1963 = vmatmul.mubr.msk.f32.vlgmr.msra.gmra.mrb[0].mxu0 %vm34_vm0, %v23_v7  ;;  %s2385_s22 = smov 32  }
   0xd   :  { %1965 = vmatprep.mubr.msk.f32.mxu0 %vm34_vm0, %v24_v17 }
  0x10   :  { %1966 = vmatmul.mubr.msk.f32.gmra.mrb[2].mxu0 %vm34_vm0, %v25_v18 }
  0x11   :  { %1986 = vmatprep.mubr.msk.f32.mxu0 %vm2365_vm1, %v2366_v20 }
  0xdf   :  { %v1964_v14 = vpop.f32.mrb[0].mxu0 }
  0xe0   :  { %v119_v15 = vadd.f32 %v1964_v14, %v2450_v13  ;;  %v113_v16 = vpop.f32.mrb[1].mxu0 }
  0xe1   :  { %v2460_v19 = vadd.f32 %v113_v16, %v2450_v13 }
  0xe3   :  { %331 = vrot.lane.b32.xlu1 %v2460_v19, %s2367_s2  ;;  %v2469_v21 = vpack.i.bf16 %v119_v15, %v2460_v19  ;;  %v2506_v37 = vpop.f32.mrb[2].mxu0  ;;  %v1856_v63 = vmul.f32 -1.442695, %v2460_v19 }
  0xe4   :  { %v2508_v38 = vpop.f32.mrb[3].mxu0  ;;  %v129_v18 = vadd.f32 %v2506_v37, %v2450_v13 }
  0xe5   :  { %2189 = vrot.lane.b32.xlu0 %v2469_v21, %s2368_s0 }
  0xe7   :  { %2199 = vrot.lane.b32.xlu1 %v2469_v21, %s2369_s10 }
  0xe9   :  { %2194 = vrot.lane.b32.xlu0 %v2469_v21, %s2370_s11 }
  0xed   :  { %511 = vrot.lane.b32.xlu0 %v2460_v19, %s2371_s12 }
 0x155   :  { %v332_v25 = vpop.permute.xlu1 %331 }
 0x157   :  { %v2190_v22 = vpop.permute.xlu0 %2189 }
 0x158   :  { %v2192_v23 = vunpack.i.h.bf16 %v2190_v22  ;;  %v2191_v24 = vunpack.i.l.bf16 %v2190_v22  ;;  %v2553_v22 = vadd.f32 %v2508_v38, %v2450_v13 }
 0x159   :  { %v2200_v32 = vpop.permute.xlu1 %2199 }
 0x15a   :  { %v2100_v27 = vpack.c.bf16 %v2192_v23, %v2191_v24  ;;  %v2202_v33 = vunpack.i.h.bf16 %v2200_v32  ;;  %v2201_v34 = vunpack.i.l.bf16 %v2200_v32  ;;  %v2558_v23 = vpack.i.bf16 %v129_v18, %v2553_v22 }
 0x15b   :  { %v2195_v28 = vpop.permute.xlu0 %2194 }
 0x15c   :  { %v2197_v29 = vunpack.i.h.bf16 %v2195_v28  ;;  %v2196_v30 = vunpack.i.l.bf16 %v2195_v28  ;;  %2102 = vmatpush3.bf16.xpose.msk.msra.mxu1 %vm2483_vm3, %v2100_v27  ;;  %v2114_v35 = vpack.c.bf16 %v2202_v33, %v2201_v34 }
 0x15d   :  { %2103 = vmatprep.subr.bf16.mxu1 %v2364_v12 }
 0x15e   :  { %v2107_v31 = vpack.c.bf16 %v2197_v29, %v2196_v30 }
 0x15f   :  { %v512_v36 = vpop.permute.xlu0 %511 }
 0x160   :  { %2109 = vmatpush3.bf16.xpose.msk.msra.mxu0 %vm2483_vm3, %v2107_v31 }
 0x161   :  { %2113 = vmatprep.subr.bf16.mxu0 %v2364_v12 }
 0x163   :  { %1973 = vmatmul.mubr.msk.f32.vlgmr.msra.gmra.mrb[0].mxu1 %vm154_vm2, %v2460_v19 }
 0x164   :  { %1979 = vmatprep.mubr.msk.f32.mxu1 %vm2365_vm1, %v2366_v20 }
 0x167   :  { %1987 = vmatmul.mubr.msk.f32.vlgmr.msra.gmra.mrb[4].mxu0 %vm154_vm2, %v332_v25 }
 0x168   :  { %2116 = vmatpush3.bf16.xpose.msk.msra.mxu0 %vm2483_vm3, %v2114_v35  ;;  %2000 = vmatprep.mubr.msk.f32.mxu0 %vm2365_vm1, %v2366_v20 }
 0x169   :  { %2127 = vmatprep.subr.bf16.mxu0 %v2364_v12 }
 0x16f   :  { %2001 = vmatmul.mubr.msk.f32.vlgmr.msra.gmra.mrb[6].mxu0 %vm154_vm2, %v512_v36 }
 0x170   :  { %2028 = vmatprep.mubr.msk.f32.mxu0 %vm2365_vm1, %v2366_v20 }
 0x236   :  { %v227_v40 = vpop.f32.mrb[0].mxu1 }
 0x237   :  { %v231_v42 = vmul.f32 0.35355338, %v227_v40  ;;  %v1974_v43 = vpop.f32.mrb[1].mxu1 }
 0x239   :  { %v232_v44 = vsel %vm2516_vm8, -1e+30, %v231_v42 }
 0x23a   :  { %v409_v45 = vpop.f32.mrb[4].mxu0  ;;  %v234_v46 = vsel %vm233_vm9, %v232_v44, -inf }
 0x23b   :  { %v413_v47 = vmul.f32 0.35355338, %v409_v45  ;;  %v1988_v48 = vpop.f32.mrb[5].mxu0  ;;  %235 = vmax.xlane.f32.xlu1 %v234_v46 }
 0x23d   :  { %v414_v49 = vsel %vm2516_vm8, -1e+30, %v413_v47 }
 0x23e   :  { %v415_v50 = vsel %vm233_vm9, %v414_v49, -inf }
 0x23f   :  { %416 = vmax.xlane.f32.xlu0 %v415_v50 }
 0x242   :  { %v589_v51 = vpop.f32.mrb[6].mxu0 }
 0x243   :  { %v593_v52 = vmul.f32 0.35355338, %v589_v51  ;;  %v2002_v53 = vpop.f32.mrb[7].mxu0 }
 0x245   :  { %v594_v54 = vsel %vm2516_vm8, -1e+30, %v593_v52 }
 0x246   :  { %v595_v55 = vsel %vm233_vm9, %v594_v54, -inf }
 0x247   :  { %596 = vmax.xlane.f32.xlu0 %v595_v55 }
 0x2c8   :  { %v236_v58 = vpop.xlane.xlu1 %235 }
 0x2c9   :  { %v237_v59 = vsub.f32 %v232_v44, %v236_v58 }
 0x2cb   :  { %v238_v60 = vmul.f32 1.442695, %v237_v59 }
 0x2cc   :  { %v417_v61 = vpop.xlane.xlu0 %416 }
 0x2cd   :  { %2276 = vpow2.f32 %v238_v60  ;;  %v418_v62 = vsub.f32 %v414_v49, %v417_v61 }
 0x2cf   :  { %v419_v0 = vmul.f32 1.442695, %v418_v62 }
 0x2d1   :  { %2278 = vpow2.f32 %v419_v0 }
 0x2d2   :  { %2280 = vpow2.f32 %v1856_v63 }
 0x2d4   :  { %v597_v10 = vpop.xlane.xlu0 %596 }
 0x2d5   :  { %v598_v14 = vsub.f32 %v594_v54, %v597_v10 }
 0x2d7   :  { %v2277_v1 = vpop.eup %2276  ;;  %v599_v15 = vmul.f32 1.442695, %v598_v14 }
 0x2d8   :  { %v240_v2 = vsel %vm233_vm9, %v2277_v1, 0.0 }
 0x2d9   :  { %241 = vadd.xlane.f32.xlu1 %v240_v2  ;;  %v2380_v2 = vmov 99  }
 0x2db   :  { %v2279_v3 = vpop.eup %2278 }
 0x2dc   :  { %v2281_v4 = vpop.eup %2280  ;;  %v421_v5 = vsel %vm233_vm9, %v2279_v3, 0.0 }
 0x2dd   :  { %422 = vadd.xlane.f32.xlu0 %v421_v5  ;;  %v145_v6 = vadd.f32 1.0, %v2281_v4 }
 0x2df   :  { %2282 = vrcp.f32 %v145_v6 }
 0x2e0   :  { %2284 = vpow2.f32 %v599_v15  ;;  %v1873_v15 = vmul.f32 -1.442695, %v2553_v22 }
 0x2e9   :  { %v2536_v7 = vpop.eup %2282 }
 0x2ea   :  { %2205 = vrot.lane.b32.xlu1 %v2469_v21, %s2374_s13  ;;  %v2285_v16 = vpop.eup %2284 }
 0x2eb   :  { %v601_v17 = vsel %vm233_vm9, %v2285_v16, 0.0 }
 0x2ee   :  { %427 = vperm.xlu1 %2209, %v2536_v7  }
 0x2f2   :  { %2211 = vrot.lane.b32.xlu1 %v2469_v21, %s2375_s14 }
 0x2f3   :  { %247 = vperm.xlu0 %2203, %v2536_v7   ;;  %2220 = vset.pattern.permute.xlu1 %v2376_v8 }
 0x2f6   :  { %2216 = vrot.lane.b32.xlu1 %v2469_v21, %s2377_s15 }
 0x2f7   :  { %2270 = vset.pattern.permute.xlu0 %v2380_v2 }
 0x2fa   :  { %607 = vperm.xlu1 %2220, %v2536_v7  }
 0x2fe   :  { %2222 = vrot.lane.b32.xlu1 %v2469_v21, %s2378_s16 }
 0x2ff   :  { %2231 = vset.pattern.permute.xlu1 %v2380_v2 }
 0x322   :  { %602 = vadd.xlane.f32.xlu1 %v601_v17 }
 0x333   :  { %691 = vrot.lane.b32.xlu1 %v2460_v19, %s2379_s17 }
 0x337   :  { %2227 = vrot.lane.b32.xlu1 %v2558_v23, %s2368_s0 }
 0x366   :  { %v242_v24 = vpop.xlane.xlu1 %241 }
 0x367   :  { %2286 = vrcp.f32 %v242_v24 }
 0x36a   :  { %v423_v25 = vpop.xlane.xlu0 %422  ;;  %v2206_v27 = vpop.permute.xlu1 %2205 }
 0x36b   :  { %2288 = vrcp.f32 %v423_v25  ;;  %v2208_v28 = vunpack.i.h.bf16 %v2206_v27  ;;  %v2207_v29 = vunpack.i.l.bf16 %v2206_v27 }
 0x36d   :  { %v2104_v30 = vpack.c.bf16 %v2208_v28, %v2207_v29 }
 0x36e   :  { %v428_v13 = vpop.permute.xlu1 %427 }
 0x36f   :  { %2105 = vmatpush3.bf16.msra.mxu1 %v2104_v30 }
 0x370   :  { %2110 = vmatprep.subr.bf16.mxu1 %v2364_v12 }
 0x371   :  { %v2287_v31 = vpop.eup %2286 }
 0x372   :  { %v2212_v19 = vpop.permute.xlu1 %2211  ;;  %v244_v32 = vmul.f32 %v2287_v31, %v2277_v1  ;;  %v248_v33 = vpop.permute.xlu0 %247 }
 0x373   :  { %v2214_v34 = vunpack.i.h.bf16 %v2212_v19  ;;  %v2213_v35 = vunpack.i.l.bf16 %v2212_v19 }
 0x374   :  { %v250_v36 = vmul.f32 %v248_v33, %v244_v32 }
 0x375   :  { %v2289_v37 = vpop.eup %2288  ;;  %v2111_v38 = vpack.c.bf16 %v2214_v34, %v2213_v35 }
 0x376   :  { %v425_v40 = vmul.f32 %v2289_v37, %v2279_v3  ;;  %v251_v42 = vsel %vm141_vm10, %v250_v36, %v244_v32  ;;  %v2217_v43 = vpop.permute.xlu1 %2216 }
 0x377   :  { %v2219_v44 = vunpack.i.h.bf16 %v2217_v43  ;;  %v2218_v45 = vunpack.i.l.bf16 %v2217_v43  ;;  %1980 = vmatmul.mubr.msk.f32.vlgmr.msra.gmra.mrb[2].mxu1 %vm233_vm9, %v251_v42 }
 0x378   :  { %v430_v46 = vmul.f32 %v428_v13, %v425_v40  ;;  %2112 = vmatpush3.bf16.msra.mxu1 %v2111_v38  ;;  %1993 = vmatprep.mubr.msk.f32.mxu1 %vm2365_vm1, %v2366_v20 }
 0x379   :  { %v2118_v47 = vpack.c.bf16 %v2219_v44, %v2218_v45  ;;  %2117 = vmatprep.subr.bf16.mxu1 %v2364_v12 }
 0x37a   :  { %v431_v48 = vsel %vm141_vm10, %v430_v46, %v425_v40  ;;  %v608_v49 = vpop.permute.xlu1 %607 }
 0x37b   :  { %1994 = vmatmul.mubr.msk.f32.vlgmr.msra.gmra.mrb[4].mxu1 %vm233_vm9, %v431_v48 }
 0x37c   :  { %2119 = vmatpush3.bf16.msra.mxu1 %v2118_v47  ;;  %2007 = vmatprep.mubr.msk.f32.mxu1 %vm2365_vm1, %v2366_v20 }
 0x37d   :  { %2120 = vmatprep.subr.bf16.mxu1 %v2364_v12 }
 0x37e   :  { %v2223_v50 = vpop.permute.xlu1 %2222 }
 0x37f   :  { %v2225_v60 = vunpack.i.h.bf16 %v2223_v50  ;;  %v2224_v61 = vunpack.i.l.bf16 %v2223_v50 }
 0x381   :  { %v2121_v0 = vpack.c.bf16 %v2225_v60, %v2224_v61 }
 0x3af   :  { %v603_v51 = vpop.xlane.xlu1 %602 }
 0x3b0   :  { %2290 = vrcp.f32 %v603_v51 }
 0x3b1   :  { %2292 = vpow2.f32 %v1873_v15 }
 0x3b3   :  { %v692_v52 = vpop.permute.xlu1 %691 }
 0x3b7   :  { %v2228_v53 = vpop.permute.xlu1 %2227 }
 0x3b8   :  { %v2230_v54 = vunpack.i.h.bf16 %v2228_v53  ;;  %v2229_v55 = vunpack.i.l.bf16 %v2228_v53 }
 0x3ba   :  { %v2291_v58 = vpop.eup %2290  ;;  %v2128_v59 = vpack.c.bf16 %v2230_v54, %v2229_v55 }
 0x3bb   :  { %v605_v62 = vmul.f32 %v2291_v58, %v2285_v16  ;;  %v2293_v31 = vpop.eup %2292 }
 0x3bc   :  { %2130 = vmatpush3.bf16.xpose.msk.msra.mxu0 %vm2483_vm3, %v2128_v59  ;;  %v904_v19 = vadd.f32 1.0, %v2293_v31 }
 0x3bd   :  { %v610_v63 = vmul.f32 %v608_v49, %v605_v62  ;;  %2138 = vmatprep.subr.bf16.mxu0 %v2364_v12 }
 0x3be   :  { %2294 = vrcp.f32 %v904_v19 }
 0x3bf   :  { %v611_v1 = vsel %vm141_vm10, %v610_v63, %v605_v62 }
 0x3c0   :  { %2008 = vmatmul.mubr.msk.f32.vlgmr.msra.gmra.mrb[6].mxu1 %vm233_vm9, %v611_v1 }
 0x3c1   :  { %2123 = vmatpush3.bf16.xpose.msk.msra.mxu1 %vm2483_vm3, %v2121_v0  ;;  %2014 = vmatprep.mubr.msk.f32.mxu1 %vm2365_vm1, %v2366_v20 }
 0x3c2   :  { %2124 = vmatprep.subr.bf16.mxu1 %v2364_v12 }
 0x3c3   :  { %2029 = vmatmul.mubr.msk.f32.vlgmr.msra.gmra.mrb[8].mxu0 %vm154_vm2, %v2553_v22 }
 0x3c4   :  { %2049 = vmatprep.mubr.msk.f32.mxu0 %vm2365_vm1, %v2366_v20 }
 0x3c8   :  { %2015 = vmatmul.mubr.msk.f32.vlgmr.msra.gmra.mrb[8].mxu1 %vm154_vm2, %v692_v52  ;;  %v2611_v32 = vpop.eup %2294 }
 0x3c9   :  { %2021 = vmatprep.mubr.msk.f32.mxu1 %vm2365_vm1, %v2366_v20 }
 0x44a   :  { %v2594_v3 = vpop.f32.mrb[2].mxu1 }
 0x44b   :  { %v1981_v4 = vpop.f32.mrb[3].mxu1 }
 0x44e   :  { %v2596_v5 = vpop.f32.mrb[4].mxu1 }
 0x44f   :  { %v1995_v6 = vpop.f32.mrb[5].mxu1 }
 0x493   :  { %v2598_v10 = vpop.f32.mrb[6].mxu1 }
 0x494   :  { %v2009_v14 = vpop.f32.mrb[7].mxu1 }
 0x496   :  { %v985_v16 = vpop.f32.mrb[8].mxu0 }
 0x497   :  { %v989_v17 = vmul.f32 0.35355338, %v985_v16  ;;  %v2030_v18 = vpop.f32.mrb[9].mxu0 }
 0x499   :  { %v990_v24 = vsel %vm2516_vm8, -1e+30, %v989_v17 }
 0x49a   :  { %v991_v25 = vsel %vm233_vm9, %v990_v24, -inf }
 0x49b   :  { %v769_v27 = vpop.f32.mrb[8].mxu1  ;;  %992 = vmax.xlane.f32.xlu1 %v991_v25 }
 0x49c   :  { %v773_v28 = vmul.f32 0.35355338, %v769_v27  ;;  %v2016_v29 = vpop.f32.mrb[9].mxu1 }
 0x49e   :  { %v774_v30 = vsel %vm2516_vm8, -1e+30, %v773_v28 }
 0x49f   :  { %v775_v13 = vsel %vm233_vm9, %v774_v30, -inf }
 0x4a0   :  { %776 = vmax.xlane.f32.xlu0 %v775_v13 }
 0x4ac   :  { %787 = vperm.xlu1 %2231, %v2536_v7  }
 0x4b0   :  { %2238 = vrot.lane.b32.xlu1 %v2558_v23, %s2374_s13 }
 0x4b1   :  { %2242 = vset.pattern.permute.xlu1 %v2373_v57 }
 0x4b4   :  { %1004 = vperm.xlu1 %2242, %v2611_v32  }
 0x4b8   :  { %1088 = vrot.lane.b32.xlu1 %v2553_v22, %s2367_s2 }
 0x4b9   :  { %2253 = vset.pattern.permute.xlu1 %v2372_v56 }
 0x528   :  { %v993_v33 = vpop.xlane.xlu1 %992 }
 0x529   :  { %v994_v34 = vsub.f32 %v990_v24, %v993_v33 }
 0x52b   :  { %v995_v35 = vmul.f32 1.442695, %v994_v34 }
 0x52c   :  { %v788_v45 = vpop.permute.xlu1 %787 }
 0x52d   :  { %2296 = vpow2.f32 %v995_v35  ;;  %v777_v36 = vpop.xlane.xlu0 %776 }
 0x52e   :  { %v778_v37 = vsub.f32 %v774_v30, %v777_v36 }
 0x530   :  { %v779_v38 = vmul.f32 1.442695, %v778_v37  ;;  %v2239_v51 = vpop.permute.xlu1 %2238 }
 0x531   :  { %v2241_v53 = vunpack.i.h.bf16 %v2239_v51 }
 0x532   :  { %2298 = vpow2.f32 %v779_v38 }
 0x534   :  { %v1005_v59 = vpop.permute.xlu1 %1004 }
 0x537   :  { %v2297_v40 = vpop.eup %2296 }
 0x538   :  { %v997_v57 = vsel %vm233_vm9, %v2297_v40, 0.0  ;;  %v1089_v6 = vpop.permute.xlu1 %1088 }
 0x539   :  { %998 = vadd.xlane.f32.xlu0 %v997_v57 }
 0x53c   :  { %v2299_v42 = vpop.eup %2298 }
 0x53d   :  { %v781_v43 = vsel %vm233_vm9, %v2299_v42, 0.0 }
 0x53e   :  { %782 = vadd.xlane.f32.xlu0 %v781_v43 }
 0x554   :  { %2233 = vrot.lane.b32.xlu0 %v2469_v21, %s2381_s18  ;;  %v2240_v21 = vunpack.i.l.bf16 %v2239_v51 }
 0x556   :  { %v2132_v60 = vpack.c.bf16 %v2241_v53, %v2240_v21 }
 0x558   :  { %2244 = vrot.lane.b32.xlu0 %v2558_v23, %s2370_s11 }
 0x5c6   :  { %v999_v56 = vpop.xlane.xlu0 %998 }
 0x5c7   :  { %2300 = vrcp.f32 %v999_v56 }
 0x5cb   :  { %v783_v44 = vpop.xlane.xlu0 %782 }
 0x5cc   :  { %2302 = vrcp.f32 %v783_v44 }
 0x5cf   :  { %v2234_v46 = vpop.permute.xlu0 %2233 }
 0x5d0   :  { %v2236_v47 = vunpack.i.h.bf16 %v2234_v46  ;;  %v2235_v48 = vunpack.i.l.bf16 %v2234_v46 }
 0x5d1   :  { %v2301_v50 = vpop.eup %2300 }
 0x5d2   :  { %v2125_v49 = vpack.c.bf16 %v2236_v47, %v2235_v48  ;;  %v1001_v55 = vmul.f32 %v2301_v50, %v2297_v40 }
 0x5d3   :  { %v2245_v63 = vpop.permute.xlu0 %2244 }
 0x5d4   :  { %2126 = vmatpush3.bf16.msra.mxu1 %v2125_v49  ;;  %v1007_v62 = vmul.f32 %v1005_v59, %v1001_v55  ;;  %v2247_v1 = vunpack.i.h.bf16 %v2245_v63  ;;  %v2246_v2 = vunpack.i.l.bf16 %v2245_v63 }
 0x5d5   :  { %2131 = vmatprep.subr.bf16.mxu1 %v2364_v12 }
 0x5d6   :  { %v2303_v52 = vpop.eup %2302  ;;  %v1008_v0 = vsel %vm141_vm10, %v1007_v62, %v1001_v55  ;;  %v2135_v4 = vpack.c.bf16 %v2247_v1, %v2246_v2 }
 0x5d7   :  { %v785_v54 = vmul.f32 %v2303_v52, %v2299_v42 }
 0x5d9   :  { %v790_v58 = vmul.f32 %v788_v45, %v785_v54 }
 0x5db   :  { %v791_v61 = vsel %vm141_vm10, %v790_v58, %v785_v54 }
 0x5dc   :  { %2022 = vmatmul.mubr.msk.f32.vlgmr.msra.gmra.mrb[10].mxu1 %vm233_vm9, %v791_v61 }
 0x5dd   :  { %2133 = vmatpush3.bf16.msra.mxu1 %v2132_v60  ;;  %2035 = vmatprep.mubr.msk.f32.mxu1 %vm2365_vm1, %v2366_v20 }
 0x5de   :  { %2134 = vmatprep.subr.bf16.mxu1 %v2364_v12 }
 0x5e0   :  { %2036 = vmatmul.mubr.msk.f32.vlgmr.msra.gmra.mrb[12].mxu1 %vm233_vm9, %v1008_v0 }
 0x5e1   :  { %2042 = vmatprep.mubr.msk.f32.mxu1 %vm2365_vm1, %v2366_v20 }
 0x5e6   :  { %2137 = vmatpush3.bf16.xpose.msk.msra.mxu1 %vm2483_vm3, %v2135_v4 }
 0x5e7   :  { %2145 = vmatprep.subr.bf16.mxu1 %v2364_v12 }
 0x5ed   :  { %2043 = vmatmul.mubr.msk.f32.vlgmr.msra.gmra.mrb[14].mxu1 %vm154_vm2, %v1089_v6 }
 0x5ee   :  { %2063 = vmatprep.mubr.msk.f32.mxu1 %vm2365_vm1, %v2366_v20 }
 0x6af   :  { %v2641_v14 = vpop.f32.mrb[10].mxu1 }
 0x6b0   :  { %v2023_v15 = vpop.f32.mrb[11].mxu1 }
 0x6b3   :  { %v2643_v16 = vpop.f32.mrb[12].mxu1 }
 0x6b4   :  { %v2037_v17 = vpop.f32.mrb[13].mxu1 }
 0x6c0   :  { %v1166_v18 = vpop.f32.mrb[14].mxu1 }
 0x6c1   :  { %v1170_v24 = vmul.f32 0.35355338, %v1166_v18  ;;  %v2044_v25 = vpop.f32.mrb[15].mxu1 }
 0x6c3   :  { %v1171_v27 = vsel %vm2516_vm8, -1e+30, %v1170_v24 }
 0x6c4   :  { %v1172_v28 = vsel %vm233_vm9, %v1171_v27, -inf }
 0x6c5   :  { %1173 = vmax.xlane.f32.xlu0 %v1172_v28 }
 0x6db   :  { %2249 = vrot.lane.b32.xlu0 %v2558_v23, %s2375_s14 }
 0x6df   :  { %2255 = vrot.lane.b32.xlu0 %v2558_v23, %s2369_s10 }
 0x752   :  { %v1174_v29 = vpop.xlane.xlu0 %1173 }
 0x753   :  { %v1175_v30 = vsub.f32 %v1171_v27, %v1174_v29 }
 0x755   :  { %v1176_v13 = vmul.f32 1.442695, %v1175_v30 }
 0x756   :  { %v2250_v31 = vpop.permute.xlu0 %2249 }
 0x757   :  { %2304 = vpow2.f32 %v1176_v13  ;;  %v2252_v19 = vunpack.i.h.bf16 %v2250_v31  ;;  %v2251_v33 = vunpack.i.l.bf16 %v2250_v31 }
 0x759   :  { %v2139_v34 = vpack.c.bf16 %v2252_v19, %v2251_v33 }
 0x75a   :  { %v2256_v38 = vpop.permute.xlu0 %2255 }
 0x75b   :  { %2140 = vmatpush3.bf16.msra.mxu0 %v2139_v34  ;;  %v2258_v57 = vunpack.i.h.bf16 %v2256_v38  ;;  %v2257_v42 = vunpack.i.l.bf16 %v2256_v38 }
 0x75c   :  { %2141 = vmatprep.subr.bf16.mxu0 %v2364_v12 }
 0x75d   :  { %v2142_v45 = vpack.c.bf16 %v2258_v57, %v2257_v42 }
 0x761   :  { %v2305_v35 = vpop.eup %2304 }
 0x762   :  { %v1178_v36 = vsel %vm233_vm9, %v2305_v35, 0.0 }
 0x763   :  { %1179 = vadd.xlane.f32.xlu1 %v1178_v36 }
 0x774   :  { %1184 = vperm.xlu1 %2253, %v2611_v32  }
 0x778   :  { %1268 = vrot.lane.b32.xlu1 %v2553_v22, %s2371_s12 }
 0x779   :  { %2264 = vset.pattern.permute.xlu1 %v2376_v8 }
 0x7f0   :  { %v1180_v37 = vpop.xlane.xlu1 %1179 }
 0x7f1   :  { %2306 = vrcp.f32 %v1180_v37 }
 0x7f4   :  { %v1185_v56 = vpop.permute.xlu1 %1184 }
 0x7f8   :  { %v1269_v8 = vpop.permute.xlu1 %1268 }
 0x7fb   :  { %v2307_v40 = vpop.eup %2306 }
 0x7fc   :  { %v1182_v43 = vmul.f32 %v2307_v40, %v2305_v35 }
 0x7fe   :  { %v1187_v44 = vmul.f32 %v1185_v56, %v1182_v43 }
 0x800   :  { %v1188_v46 = vsel %vm141_vm10, %v1187_v44, %v1182_v43 }
 0x801   :  { %2050 = vmatmul.mubr.msk.f32.vlgmr.msra.gmra.mrb[10].mxu0 %vm233_vm9, %v1188_v46 }
 0x802   :  { %2144 = vmatpush3.bf16.xpose.msk.msra.mxu0 %vm2483_vm3, %v2142_v45  ;;  %2056 = vmatprep.mubr.msk.f32.mxu0 %vm2365_vm1, %v2366_v20  ;;  %v1661_v45 = vrot.slane %v2366_v20, 5 }
 0x803   :  { %2152 = vmatprep.subr.bf16.mxu0 %v2364_v12 }
 0x809   :  { %2057 = vmatmul.mubr.msk.f32.vlgmr.msra.gmra.mrb[12].mxu0 %vm154_vm2, %v1269_v8  ;;  %v1703_v8 = vrot.slane %v2366_v20, 7 }
 0x80a   :  { %2077 = vmatprep.mubr.msk.f32.mxu0 %vm2365_vm1, %v2366_v20 }
 0x8d4   :  { %v1264_v47 = vpop.f32.mrb[10].mxu0 }
 0x8d5   :  { %v2051_v48 = vpop.f32.mrb[11].mxu0 }
 0x8d6   :  { %v1678_v48 = vsub.s32 4, %v2439_v9 }
 0x8dc   :  { %v1346_v49 = vpop.f32.mrb[12].mxu0 }
 0x8dd   :  { %v1350_v50 = vmul.f32 0.35355338, %v1346_v49  ;;  %v2058_v51 = vpop.f32.mrb[13].mxu0 }
 0x8df   :  { %v1351_v52 = vsel %vm2516_vm8, -1e+30, %v1350_v50 }
 0x8e0   :  { %v1352_v53 = vsel %vm233_vm9, %v1351_v52, -inf }
 0x8e1   :  { %1353 = vmax.xlane.f32.xlu0 %v1352_v53  ;;  %v1714_v53 = vsub.s32 2, %v2439_v9 }
 0x8f7   :  { %2260 = vrot.lane.b32.xlu0 %v2558_v23, %s2377_s15 }
 0x8fb   :  { %2266 = vrot.lane.b32.xlu0 %v2558_v23, %s2378_s16 }
 0x96e   :  { %v1354_v21 = vpop.xlane.xlu0 %1353 }
 0x96f   :  { %v1355_v54 = vsub.f32 %v1351_v52, %v1354_v21  ;;  %v1696_v21 = vrot.slane %v2445_v11, %v1695_v39 }
 0x971   :  { %v1356_v55 = vmul.f32 1.442695, %v1355_v54 }
 0x972   :  { %v2261_v58 = vpop.permute.xlu0 %2260 }
 0x973   :  { %2308 = vpow2.f32 %v1356_v55  ;;  %v2263_v59 = vunpack.i.h.bf16 %v2261_v58  ;;  %v2262_v60 = vunpack.i.l.bf16 %v2261_v58 }
 0x975   :  { %v2146_v61 = vpack.c.bf16 %v2263_v59, %v2262_v60  ;;  %v1679_v60 = vrot.slane %v2445_v11, %v1678_v48 }
 0x976   :  { %v2267_v1 = vpop.permute.xlu0 %2266 }
 0x977   :  { %2147 = vmatpush3.bf16.msra.mxu1 %v2146_v61  ;;  %v2269_v4 = vunpack.i.h.bf16 %v2267_v1  ;;  %v2268_v6 = vunpack.i.l.bf16 %v2267_v1  ;;  %v1715_v1 = vrot.slane %v2445_v11, %v1714_v53 }
 0x978   :  { %2148 = vmatprep.subr.bf16.mxu1 %v2364_v12 }
 0x979   :  { %v2149_v24 = vpack.c.bf16 %v2269_v4, %v2268_v6 }
 0x97d   :  { %v2309_v62 = vpop.eup %2308 }
 0x97e   :  { %v1358_v63 = vsel %vm233_vm9, %v2309_v62, 0.0 }
 0x97f   :  { %1359 = vadd.xlane.f32.xlu1 %v1358_v63 }
 0x990   :  { %1364 = vperm.xlu1 %2264, %v2611_v32  }
 0x994   :  { %1448 = vrot.lane.b32.xlu1 %v2553_v22, %s2379_s17 }
 0xa0c   :  { %v1360_v0 = vpop.xlane.xlu1 %1359 }
 0xa0d   :  { %2310 = vrcp.f32 %v1360_v0 }
 0xa10   :  { %v1365_v17 = vpop.permute.xlu1 %1364 }
 0xa14   :  { %v1449_v22 = vpop.permute.xlu1 %1448 }
 0xa17   :  { %v2311_v2 = vpop.eup %2310 }
 0xa18   :  { %v1362_v15 = vmul.f32 %v2311_v2, %v2309_v62 }
 0xa1a   :  { %v1367_v18 = vmul.f32 %v1365_v17, %v1362_v15 }
 0xa1c   :  { %v1368_v12 = vsel %vm141_vm10, %v1367_v18, %v1362_v15 }
 0xa1d   :  { %2064 = vmatmul.mubr.msk.f32.vlgmr.msra.gmra.mrb[16].mxu1 %vm233_vm9, %v1368_v12 }
 0xa1e   :  { %2151 = vmatpush3.bf16.xpose.msk.msra.mxu1 %vm2483_vm3, %v2149_v24  ;;  %2070 = vmatprep.mubr.msk.f32.mxu1 %vm2365_vm1, %v2366_v20  ;;  %vm1702_vm1 = vcmask 1040384   ;;  %vm890_vm3 = vcmask 31744  }
 0xa25   :  { %2071 = vmatmul.mubr.msk.f32.vlgmr.msra.gmra.mrb[18].mxu1 %vm154_vm2, %v1449_v22 }
 0xaf0   :  { %v1444_v25 = vpop.f32.mrb[16].mxu1 }
 0xaf1   :  { %v2065_v27 = vpop.f32.mrb[17].mxu1 }
 0xaf8   :  { %v1526_v28 = vpop.f32.mrb[18].mxu1 }
 0xaf9   :  { %v1530_v29 = vmul.f32 0.35355338, %v1526_v28  ;;  %v2072_v30 = vpop.f32.mrb[19].mxu1 }
 0xafb   :  { %v1531_v13 = vsel %vm2516_vm8, -1e+30, %v1530_v29 }
 0xafc   :  { %v1532_v31 = vsel %vm233_vm9, %v1531_v13, -inf }
 0xafd   :  { %1533 = vmax.xlane.f32.xlu0 %v1532_v31 }
 0xb13   :  { %1544 = vperm.xlu0 %2270, %v2611_v32  }
 0xb8a   :  { %v1534_v26 = vpop.xlane.xlu0 %1533 }
 0xb8b   :  { %v1535_v19 = vsub.f32 %v1531_v13, %v1534_v26  ;;  %v1733_v13 = vld [vmem:[%s2794_s3] sm:$0xff]  ;;  %v1735_v26 = vld [vmem:[%s2794_s3 + $0x10] sm:$0xff] }
 0xb8d   :  { %v1536_v33 = vmul.f32 1.442695, %v1535_v19  ;;  %v1736_v19 = vld [vmem:[%s2794_s3 + $0x18] sm:$0xff] }
 0xb8f   :  { %2312 = vpow2.f32 %v1536_v33  ;;  %v2159_v33 = vpack.c.bf16 %v1736_v19, %v1735_v26 }
 0xb92   :  { %v1545_v42 = vpop.permute.xlu0 %1544 }
 0xb99   :  { %v2313_v34 = vpop.eup %2312 }
 0xb9a   :  { %v1538_v35 = vsel %vm233_vm9, %v2313_v34, 0.0 }
 0xb9b   :  { %1539 = vadd.xlane.f32.xlu1 %v1538_v35 }
 0xbac   :  { %2272 = vrot.lane.b32.xlu1 %v2558_v23, %s2381_s18 }
 0xbb0   :  { %872 = vrot.lane.b32.xlu1 %v2596_v5, %s2382_s19 }
 0xbb4   :  { %876 = vrot.lane.b32.xlu1 %v2598_v10, %s2383_s20 }
 0xbb8   :  { %1629 = vrot.lane.b32.xlu1 %v1264_v47, %s2382_s19 }
 0xbbc   :  { %880 = vrot.lane.b32.xlu1 %v2641_v14, %s2384_s21 }
 0xbc0   :  { %1633 = vrot.lane.b32.xlu1 %v1444_v25, %s2383_s20 }
 0xbc4   :  { %887 = vrot.lane.b32.xlu1 %v2536_v7, %s2385_s22 }
 0xbc8   :  { %1643 = vrot.lane.b32.xlu1 %v2611_v32, %s2385_s22  ;;  %v1672_v32 = vsub.s32 0, %v2439_v9 }
 0xbca   :  { %v1673_v49 = vrot.slane %v2445_v11, %v1672_v32 }
 0xc28   :  { %v1540_v41 = vpop.xlane.xlu1 %1539 }
 0xc29   :  { %2314 = vrcp.f32 %v1540_v41 }
 0xc2c   :  { %v2273_v23 = vpop.permute.xlu1 %2272 }
 0xc2d   :  { %v2275_v36 = vunpack.i.h.bf16 %v2273_v23  ;;  %v2274_v5 = vunpack.i.l.bf16 %v2273_v23 }
 0xc2f   :  { %v2153_v37 = vpack.c.bf16 %v2275_v36, %v2274_v5 }
 0xc30   :  { %v873_v38 = vpop.permute.xlu1 %872 }
 0xc31   :  { %2154 = vmatpush3.bf16.msra.mxu0 %v2153_v37  ;;  %v883_v44 = vsel %vm154_vm2, %v2594_v3, %v873_v38 }
 0xc33   :  { %v2315_v10 = vpop.eup %2314 }
 0xc34   :  { %v877_v40 = vpop.permute.xlu1 %876  ;;  %v1542_v57 = vmul.f32 %v2315_v10, %v2313_v34 }
 0xc35   :  { %v884_v46 = vsel %vm233_vm9, %v883_v44, %v877_v40 }
 0xc36   :  { %v1547_v43 = vmul.f32 %v1545_v42, %v1542_v57 }
 0xc38   :  { %v1630_v14 = vpop.permute.xlu1 %1629  ;;  %v1548_v56 = vsel %vm141_vm10, %v1547_v43, %v1542_v57 }
 0xc39   :  { %v1640_v7 = vsel %vm154_vm2, %v2643_v16, %v1630_v14  ;;  %2078 = vmatmul.mubr.msk.f32.vlgmr.msra.gmra.mrb[14].mxu0 %vm233_vm9, %v1548_v56  ;;  %v1684_v16 = vrot.slane %v2366_v20, 6  ;;  %vm1701_vm2 = vcmp.ge.s32.totalorder %v2439_v9, 1  ;;  %v1725_v20 = vsub.s32 3, %v2439_v9 }
 0xc3b   :  { %v1726_v4 = vrot.slane %v2445_v11, %v1725_v20  ;;  %v1734_v11 = vld [vmem:[%s2794_s3 + $0x8] sm:$0xff]  ;;  %s2386_s3 = smov [#allocation4]  }
 0xc3c   :  { %v881_v47 = vpop.permute.xlu1 %880  ;;  %v2155_v31 = vpack.c.bf16 %v1734_v11, %v1733_v13  ;;  %s1840_s30 = sshll.u32 %s2386_s3, 4  ;;  %s1841_s30 = int_to_ptr.vmem [resolvable:$true] %s1840_s30 }
 0xc3d   :  { %v886_v3 = vsel %vm885_vm11, %v884_v46, %v881_v47  ;;  %s2316_s6 = scalar_lea.vmem %s1841_s30, 16  ;;  %s2320_s7 = scalar_lea.vmem %s1841_s30, 32 }
 0xc3e   :  { %v1662_v50 = vrot.slane %v886_v3, 5  ;;  %v1685_v51 = vrot.slane %v886_v3, 6  ;;  %v1704_v52 = vrot.slane %v886_v3, 7  ;;  %v1727_v22 = vmul.f32 %v1726_v4, %v886_v3  ;;  %2156 = vmatprep.subr.bf16.mxu0 %v2155_v31  ;;  %p2317_p0 = scmp.ne.s32.totalorder %s1841_s30, %s2316_s6  ;;  %p2321_p1 = scmp.lt.s32.totalorder %s1841_s30, %s1841_s30 }
 0xc3f   :  { %2158 = vmatpush3.bf16.msra.mxu0 %v2155_v31  ;;  %p2322_p2 = scmp.lt.s32.totalorder %s2320_s7, %s2316_s6 }
 0xc40   :  { %v1663_v54 = vsel %vm1660_vm13, %v1661_v45, %v1662_v50  ;;  %v1686_v55 = vsel %vm1683_vm15, %v1684_v16, %v1685_v51  ;;  %v1705_v58 = vsel %vm1702_vm1, %v1703_v8, %v1704_v52  ;;  %v1634_v59 = vpop.permute.xlu1 %1633  ;;  %2160 = vmatprep.subr.bf16.mxu0 %v2159_v33 }
 0xc41   :  { %v1668_v61 = vsel %vm1656_vm12, %v1663_v54, 0.0  ;;  %v1691_v62 = vsel %vm1682_vm14, %v1686_v55, 0.0  ;;  %v1641_v63 = vsel %vm233_vm9, %v1640_v7, %v1634_v59  ;;  %v1710_v2 = vsel %vm1701_vm2, %v1705_v58, 0.0  ;;  %p2323_p3 = por %p2322_p2, %p2321_p1 }
 0xc42   :  { %v1674_v0 = vmul.f32 %v1673_v49, %v1668_v61  ;;  %v1697_v6 = vmul.f32 %v1696_v21, %v1691_v62  ;;  %v1716_v12 = vmul.f32 %v1715_v1, %v1710_v2 }
 0xc43   :  { %2162 = vmatpush3.bf16.msra.mxu0 %v2159_v33  ;;  %p2324_p4 = pnand %p2323_p3, %p2317_p0 }
 0xc44   :  { %v888_v15 = vpop.permute.xlu1 %887  ;;  %v1680_v17 = vadd.f32 %v1679_v60, %v1674_v0 }
 0xc45   :  { %v891_v18 = vsel %vm890_vm3, %v888_v15, 0.0 }
 0xc46   :  { %v1699_v24 = vadd.f32 %v1697_v6, %v1680_v17 }
 0xc48   :  { %v1644_v25 = vpop.permute.xlu1 %1643  ;;  %v1718_v27 = vadd.f32 %v1716_v12, %v1699_v24 }
 0xc49   :  { %v1646_v28 = vsel %vm890_vm3, %v1644_v25, 0.0 }
 0xc4a   :  { %1647 = vadd.xlane.f32.xlu1 %v1646_v28  ;;  %v1729_v29 = vadd.f32 %v1727_v22, %v1718_v27 }
 0xc4c   :  { %v1731_v30 = vadd.f32 %v1729_v29, %v886_v3 }
 0xc4e   :  { %2088 = vmatprep.mubr.msk.f32.mxu0 %vm34_vm0, %v1731_v30 }
 0xcd7   :  { %v1648_v8 = vpop.xlane.xlu1 %1647 }
 0xcd8   :  { %v1649_v47 = vrot.slane %v1648_v8, 4 }
 0xcda   :  { %v1650_v48 = vadd.f32 %v1649_v47, %v1648_v8 }
 0xcdc   :  { %v1651_v3 = vrot.slane %v1650_v48, 2 }
 0xd0c   :  { %v1624_v34 = vpop.f32.mrb[14].mxu0 }
 0xd0d   :  { %1637 = vrot.lane.b32.xlu0 %v1624_v34, %s2384_s21  ;;  %v2079_v35 = vpop.f32.mrb[15].mxu0 }
 0xd2c   :  { %892 = vadd.xlane.f32.xlu0 %v891_v18 }
 0xd7f   :  { %v1638_v41 = vpop.permute.xlu0 %1637 }
 0xd80   :  { %v1642_v23 = vsel %vm885_vm11, %v1641_v63, %v1638_v41 }
 0xd81   :  { %v1664_v36 = vrot.slane %v1642_v23, 5  ;;  %v1687_v5 = vrot.slane %v1642_v23, 6  ;;  %v1706_v37 = vrot.slane %v1642_v23, 7  ;;  %v1728_v39 = vmul.f32 %v1726_v4, %v1642_v23 }
 0xd83   :  { %v1665_v38 = vsel %vm1660_vm13, %v1662_v50, %v1664_v36  ;;  %v1688_v10 = vsel %vm1683_vm15, %v1685_v51, %v1687_v5  ;;  %v1707_v40 = vsel %vm1702_vm1, %v1704_v52, %v1706_v37 }
 0xd84   :  { %v1669_v57 = vsel %vm1656_vm12, %v1665_v38, 0.0  ;;  %v1692_v42 = vsel %vm1682_vm14, %v1688_v10, 0.0  ;;  %v1711_v14 = vsel %vm1701_vm2, %v1707_v40, 0.0 }
 0xd85   :  { %v1675_v43 = vmul.f32 %v1673_v49, %v1669_v57  ;;  %v1698_v7 = vmul.f32 %v1696_v21, %v1692_v42  ;;  %v1717_v44 = vmul.f32 %v1715_v1, %v1711_v14  ;;  %v1652_v49 = vadd.f32 %v1651_v3, %v1650_v48 }
 0xd87   :  { %v1681_v56 = vadd.f32 %v1679_v60, %v1675_v43  ;;  %v1653_v53 = vrot.slane %v1652_v49, 1 }
 0xd89   :  { %v1700_v32 = vadd.f32 %v1698_v7, %v1681_v56  ;;  %v1654_v54 = vadd.f32 %v1653_v53, %v1652_v49 }
 0xd8b   :  { %v1719_v45 = vadd.f32 %v1717_v44, %v1700_v32 }
 0xd8d   :  { %v1730_v46 = vadd.f32 %v1728_v39, %v1719_v45 }
 0xd8f   :  { %v1732_v16 = vadd.f32 %v1730_v46, %v1642_v23 }
 0xd91   :  { %2089 = vmatmul.mubr.msk.f32.vlgmr.msra.gmra.mrb[16].mxu0 %vm34_vm0, %v1732_v16 }
 0xdb9   :  { %v893_v50 = vpop.xlane.xlu0 %892 }
 0xdba   :  { %v894_v51 = vrot.slane %v893_v50, 4 }
 0xdbc   :  { %v895_v52 = vadd.f32 %v894_v51, %v893_v50 }
 0xdbe   :  { %v896_v9 = vrot.slane %v895_v52, 2 }
 0xdc0   :  { %v897_v20 = vadd.f32 %v896_v9, %v895_v52 }
 0xdc2   :  { %v898_v21 = vrot.slane %v897_v20, 1 }
 0xdc4   :  { %v899_v55 = vadd.f32 %v898_v21, %v897_v20 }
 0xdc6   :  { %v1655_v58 = vadd.f32 %v1654_v54, %v899_v55 }
 0xdc8   :  { %1821 = vst.msk [vmem:[#allocation4] sm:$0x1] %vm1820_vm4, %v1655_v58 }
 0xdc9   :  { %2327 = shalt.err (!%p2324_p4)
}
 0xdca   :  { %s2328_s2 = scalar_lea.hbm %s2796_s5, 16 }
 0xdcb   :  { %p2329_p5 = scmp.ne.s32.totalorder %s2796_s5, %s2328_s2  ;;  %p2332_p6 = scmp.lt.u32.totalorder %s2328_s2, %s2796_s5 }
 0xdcd   :  { %p2334_p7 = pnand %p2332_p6, %p2329_p5 }
 0xdcf   :  { %2337 = shalt.err (!%p2334_p7)
}
 0xdd0   :  { %1843 = dma.vmem_to_hbm [thread:$0]  %s1841_s30, 16, %s2796_s5, [#allocation5]  }
 0xdd1   :  { %s2387_s15 = smov [#allocation2]  }
 0xdd2   :  { %s1827_s16 = sshll.u32 %s2387_s15, 4  ;;  %s1828_s16 = int_to_ptr.vmem [resolvable:$true] %s1827_s16 }
 0xdd3   :  { %s2338_s17 = scalar_lea.vmem %s1828_s16, 256  ;;  %p2343_p9 = scmp.lt.s32.totalorder %s1828_s16, %s1828_s16 }
 0xdd4   :  { %p2339_p8 = scmp.ne.s32.totalorder %s1828_s16, %s2338_s17  ;;  %p2344_p10 = scmp.lt.s32.totalorder %s2338_s17, %s2338_s17 }
 0xdd6   :  { %p2345_p11 = por %p2344_p10, %p2343_p9 }
 0xdd8   :  { %p2346_p12 = pnand %p2345_p11, %p2339_p8 }
 0xe64   :  { %v2090_v59 = vpop.f32.mrb[16].mxu0 }
 0xe65   :  { %1819 = vst.msk [vmem:[#allocation2 + $0x8] sm:$0xff] %vm34_vm0, %v2090_v59  ;;  %v1809_v60 = vpop.f32.mrb[17].mxu0 }
 0xe66   :  { %1818 = vst.msk [vmem:[#allocation2] sm:$0xff] %vm34_vm0, %v1809_v60 }
 0xe67   :  { %2349 = shalt.err (!%p2346_p12)
}
 0xe68   :  { %s2350_s5 = scalar_lea.hbm %s2795_s4, 256 }
 0xe69   :  { %p2351_p13 = scmp.ne.s32.totalorder %s2795_s4, %s2350_s5  ;;  %p2354_p0 = scmp.lt.u32.totalorder %s2350_s5, %s2795_s4 }
 0xe6b   :  { %p2356_p1 = pnand %p2354_p0, %p2351_p13 }
 0xe6d   :  { %2359 = shalt.err (!%p2356_p1)
}
 0xe6e   :  { %s2388_s25 = smov 128  }
 0xe6f   :  { %1833 = dma.vmem_to_hbm [thread:$0]  %s1828_s16, 256, %s2795_s4, [#allocation3], %s2388_s25, %s2388_s25, %s2382_s19  }
 0xe70   :  { %2360 = dma.done.wait [#allocation3], 256  }
 0xe71   :  { %2361 = vsyncadd [#allocation3], 4294967040 }
 0xe72   :  { %2362 = dma.done.wait [#allocation5], 16  }
 0xe73   :  { %2363 = vsyncadd [#allocation5], 4294967280 }
 0xe74   :  { %1850 = vsyncpa [#allocation3], 1 }
 0xe75   :  { %1851 = vsyncpa [#allocation5], 1 }

</bundles_post_ra>
